<compile_context>
chip_gen: v7x
topology: tpu7x:2x2x1
jax: 0.10.0
libtpu: 0.0.40
codegen_flags: <defaults>
</compile_context>

<pallas_src>
import functools

import jax
import jax.numpy as jnp
from jax import lax
from jax.experimental import pallas as pl
from jax.experimental.pallas import tpu as pltpu

EPS = 1e-5


def _vmem_limit_bytes():
    """Per-generation scoped-VMEM limit (75% of physical, capped), with a safe fallback."""
    try:
        info = pltpu.get_tpu_info()
        cap = int(getattr(info, "vmem_capacity_bytes", 0) or 0)
        if cap > 0:
            return min(cap * 3 // 4, 112 * 1024 * 1024)
    except Exception:
        pass
    return 32 * 1024 * 1024


def _choose_tiling(sp, cin, cout, halo_block, vmem_limit):
    """Pick lane tile (multiple of halo_block) and an even tile count from a VMEM budget."""
    budget = max(vmem_limit // 2, 2 * 1024 * 1024)
    # bytes per lane of tile: double-buffered bf16 input + bf16 scratch + double-buffered fp32 out
    per_lane = 2 * cin * 2 + cin * 2 + 2 * cout * 4
    t_cap = max(halo_block, (budget // per_lane) // halo_block * halo_block)
    n_tiles = -(-sp // t_cap)                      # ceil
    n_tiles = max(2, 2 * (-(-n_tiles // 2)))       # even and >= 2 (v7x two-core split)
    tile = halo_block * (-(-sp // (n_tiles * halo_block)))
    return tile, n_tiles


def _conv_tile(w_ref, xw_ref, tap_offsets, tile):
    """9 shifted (Cout,Cin)@(Cin,tile) MXU matmuls accumulated in fp32."""
    acc = None
    for k, off in enumerate(tap_offsets):
        part = jnp.dot(w_ref[k], xw_ref[:, off:off + tile],
                       preferred_element_type=jnp.float32)
        acc = part if acc is None else acc + part
    return acc


def _stats_kernel(w_ref, xm_ref, xh_ref, mask_ref, sum_ref, ssq_ref, xw_ref,
                  *, tap_offsets, tile):
    """Phase 1: recompute conv tile, accumulate interior-masked per-channel sum / sumsq."""

    @pl.when(pl.program_id(1) == 0)
    def _():
        sum_ref[...] = jnp.zeros_like(sum_ref)
        ssq_ref[...] = jnp.zeros_like(ssq_ref)

    # Assemble the overlapping window (aligned tile + halo block) contiguously in VMEM.
    xw_ref[:, :tile] = xm_ref[...]
    xw_ref[:, tile:] = xh_ref[...]

    y = _conv_tile(w_ref, xw_ref, tap_offsets, tile)       # (Cout, tile) fp32
    m = mask_ref[...].astype(jnp.float32)                  # (1, tile), 1.0 on real pixels
    ym = y * m
    sum_ref[...] += jnp.sum(ym, axis=1, keepdims=True)[None]
    ssq_ref[...] += jnp.sum(y * ym, axis=1, keepdims=True)[None]


def _bn_relu_kernel(w_ref, scale_ref, shift_ref, xm_ref, xh_ref, o_ref, xw_ref,
                    *, tap_offsets, tile):
    """Phase 2: recompute conv tile and apply folded BN scale/shift + ReLU (lane-dense)."""
    xw_ref[:, :tile] = xm_ref[...]
    xw_ref[:, tile:] = xh_ref[...]
    y = _conv_tile(w_ref, xw_ref, tap_offsets, tile)
    o_ref[...] = jnp.maximum(y * scale_ref[...] + shift_ref[...], 0.0).astype(o_ref.dtype)


@jax.jit
def block_forward(x, weight, bias, gamma, beta):
    """Conv3x3(pad=1) -> BatchNorm2d (training-mode batch stats) -> ReLU.

    x      : (N, Cin, H, W)    float32, NCHW
    weight : (Cout, Cin, 3, 3) OIHW conv weight
    bias   : (Cout,)           conv bias (cancelled exactly by training-mode BN)
    gamma  : (Cout,)           BN weight
    beta   : (Cout,)           BN bias
    returns (N, Cout, H, W)
    """
    del bias  # per-channel constant before training-mode BN -> removed by mean subtraction

    N, Cin, H, W = x.shape
    Cout = weight.shape[0]

    wp2 = W + 2
    plane = (H + 2) * wp2
    sp = N * plane                    # padded-grid positions (output computed on all of them)
    s_real = N * H * W                # real output pixels (BN count)
    halo = W + 3                      # max |tap offset| on the flattened padded grid
    halo_block = ((2 * halo + 127) // 128) * 128

    vmem_limit = _vmem_limit_bytes()
    tile, n_tiles = _choose_tiling(sp, Cin, Cout, halo_block, vmem_limit)
    n_half = n_tiles // 2
    halo_blocks_per_tile = tile // halo_block
    sq = n_tiles * tile               # padded, lane-dense spatial extent (multiple of tile)
    ell = sq + halo_block             # X_ext lane extent (left halo + data + right pad)

    # ---- layout plumbing (cheap, ~1x input): channel-major, zero-padded, flattened, bf16
    xp = jnp.pad(jnp.transpose(x, (1, 0, 2, 3)), ((0, 0), (0, 0), (1, 1), (1, 1)))
    x_ext = jnp.pad(xp.reshape(Cin, sp).astype(jnp.bfloat16),
                    ((0, 0), (halo, ell - halo - sp)))                      # (Cin, ell)

    # per-tap weights, k = kh*3 + kw  <->  window lane offset kh*(W+2)+kw
    w_taps = jnp.transpose(weight, (2, 3, 0, 1)).reshape(9, Cout, Cin).astype(jnp.bfloat16)
    tap_offsets = tuple(kh * wp2 + kw for kh in range(3) for kw in range(3))

    # interior mask over the padded grid (exact 0.0 / 1.0, bf16 to halve its stream)
    q = jnp.arange(sq, dtype=jnp.int32)
    r = q % plane
    ii = r // wp2
    jj = r % wp2
    interior = (q < sp) & (ii >= 1) & (ii <= H) & (jj >= 1) & (jj <= W)
    mask = interior.astype(jnp.bfloat16).reshape(1, sq)

    # ---- phase 1: global per-channel sum / sumsq (2-way core split x tile reduction) ----
    csum, cssq = pl.pallas_call(
        functools.partial(_stats_kernel, tap_offsets=tap_offsets, tile=tile),
        grid=(2, n_half),
        in_specs=[
            pl.BlockSpec((9, Cout, Cin), lambda c, s: (0, 0, 0)),
            pl.BlockSpec((Cin, tile), lambda c, s: (0, c * n_half + s)),
            pl.BlockSpec((Cin, halo_block),
                         lambda c, s: (0, (c * n_half + s + 1) * halo_blocks_per_tile)),
            pl.BlockSpec((1, tile), lambda c, s: (0, c * n_half + s)),
        ],
        out_specs=(
            pl.BlockSpec((1, Cout, 1), lambda c, s: (c, 0, 0)),   # resident per-core accumulator
            pl.BlockSpec((1, Cout, 1), lambda c, s: (c, 0, 0)),
        ),
        out_shape=(
            jax.ShapeDtypeStruct((2, Cout, 1), jnp.float32),
            jax.ShapeDtypeStruct((2, Cout, 1), jnp.float32),
        ),
        scratch_shapes=[pltpu.VMEM((Cin, tile + halo_block), jnp.bfloat16)],
        compiler_params=pltpu.CompilerParams(
            dimension_semantics=("parallel", "arbitrary"),
            vmem_limit_bytes=vmem_limit,
        ),
    )(w_taps, x_ext, x_ext, mask)

    # ---- fold BN stats once (tiny (Cout,) XLA math) ----
    inv_count = 1.0 / float(s_real)
    mean = jnp.sum(csum, axis=0) * inv_count                              # (Cout, 1)
    var = jnp.maximum(jnp.sum(cssq, axis=0) * inv_count - mean * mean, 0.0)
    scale = gamma.reshape(Cout, 1).astype(jnp.float32) * lax.rsqrt(var + EPS)
    shift = beta.reshape(Cout, 1).astype(jnp.float32) - mean * scale

    # ---- phase 2: recompute conv + scale/shift + ReLU, lane-dense output ----
    yf = pl.pallas_call(
        functools.partial(_bn_relu_kernel, tap_offsets=tap_offsets, tile=tile),
        grid=(n_tiles,),
        in_specs=[
            pl.BlockSpec((9, Cout, Cin), lambda s: (0, 0, 0)),
            pl.BlockSpec((Cout, 1), lambda s: (0, 0)),
            pl.BlockSpec((Cout, 1), lambda s: (0, 0)),
            pl.BlockSpec((Cin, tile), lambda s: (0, s)),
            pl.BlockSpec((Cin, halo_block), lambda s: (0, (s + 1) * halo_blocks_per_tile)),
        ],
        out_specs=pl.BlockSpec((Cout, tile), lambda s: (0, s)),
        out_shape=jax.ShapeDtypeStruct((Cout, sq), jnp.float32),
        scratch_shapes=[pltpu.VMEM((Cin, tile + halo_block), jnp.bfloat16)],
        compiler_params=pltpu.CompilerParams(
            dimension_semantics=("parallel",),     # independent tiles -> megacore on v7x
            vmem_limit_bytes=vmem_limit,
        ),
    )(w_taps, scale, shift, x_ext, x_ext)

    # drop the padded-grid border garbage and return NCHW
    y = yf[:, :sp].reshape(Cout, N, H + 2, W + 2)[:, :, 1:H + 1, 1:W + 1]
    return jnp.transpose(y, (1, 0, 2, 3)).astype(x.dtype)


def _reference(x, weight, bias, gamma, beta):
    """Pure-JAX reference: conv -> training-mode BN -> ReLU, NCHW, fp32."""
    y = lax.conv_general_dilated(
        x, weight,
        window_strides=(1, 1), padding=((1, 1), (1, 1)),
        dimension_numbers=("NCHW", "OIHW", "NCHW"),
        precision=lax.Precision.HIGHEST,
    ) + bias[None, :, None, None]
    mean = jnp.mean(y, axis=(0, 2, 3), keepdims=True)
    var = jnp.mean((y - mean) ** 2, axis=(0, 2, 3), keepdims=True)
    y = (y - mean) * lax.rsqrt(var + EPS)
    y = y * gamma[None, :, None, None] + beta[None, :, None, None]
    return jnp.maximum(y, 0.0)


if __name__ == "__main__":
    key = jax.random.PRNGKey(0)
    k_x, k_w, k_b = jax.random.split(key, 3)

    N, Cin, Cout, H, W = 2, 4, 8, 16, 16

    x = jax.random.normal(k_x, (N, Cin, H, W), dtype=jnp.float32)
    weight = 0.1 * jax.random.normal(k_w, (Cout, Cin, 3, 3), dtype=jnp.float32)
    bias = 0.05 * jax.random.normal(k_b, (Cout,), dtype=jnp.float32)
    gamma = jnp.ones((Cout,), dtype=jnp.float32)   # BatchNorm2d default init
    beta = jnp.zeros((Cout,), dtype=jnp.float32)

    out = jax.block_until_ready(block_forward(x, weight, bias, gamma, beta))
    ref = _reference(x, weight, bias, gamma, beta)

    assert out.shape == (N, Cout, H, W)
    max_err = jnp.max(jnp.abs(out - ref))
    assert jnp.allclose(out, ref, atol=2e-2, rtol=2e-2), f"max abs err = {max_err}"

    print("KERNEL_OK")
</pallas_src>

<mosaic_0001>
module attributes {stable_mosaic.version = 11 : i64} {
  func.func @_stats_kernel(%arg0: i32, %arg1: i32, %arg2: memref<9x8x4xbf16, #tpu.memory_space<vmem>>, %arg3: memref<4x384xbf16, #tpu.memory_space<vmem>>, %arg4: memref<4x128xbf16, #tpu.memory_space<vmem>>, %arg5: memref<1x384xbf16, #tpu.memory_space<vmem>>, %arg6: memref<1x8x1xf32, #tpu.memory_space<vmem>>, %arg7: memref<1x8x1xf32, #tpu.memory_space<vmem>>, %arg8: memref<4x512xbf16, #tpu.memory_space<vmem>>) attributes {dimension_semantics = [#tpu.dimension_semantics<parallel>, #tpu.dimension_semantics<arbitrary>], iteration_bounds = array<i64: 2, 1>, scalar_prefetch = 0 : i64, scratch_operands = 1 : i64, tpu.core_type = #tpu.core_type<tc>, window_params = [{pipeline_mode = #tpu.pipeline_mode<synchronous>, transform_indices = @transform_0, window_bounds = array<i64: 9, 8, 4>}, {transform_indices = @transform_1, window_bounds = array<i64: 4, 384>}, {transform_indices = @transform_2, window_bounds = array<i64: 4, 128>}, {transform_indices = @transform_3, window_bounds = array<i64: 1, 384>}, {transform_indices = @transform_4, window_bounds = array<i64: 1, 8, 1>}, {transform_indices = @transform_5, window_bounds = array<i64: 1, 8, 1>}]} {
    %c0_i32 = arith.constant 0 : i32
    %0 = arith.cmpi eq, %arg1, %c0_i32 : i32
    %1 = arith.extui %0 : i1 to i32
    %c0_i32_0 = arith.constant 0 : i32
    %2 = arith.cmpi ne, %1, %c0_i32_0 : i32
    scf.if %2 {
      %cst_62 = arith.constant 0.000000e+00 : f32
      %68 = vector.broadcast %cst_62 : f32 to vector<1x8x1xf32>
      %c0_63 = arith.constant 0 : index
      %c0_64 = arith.constant 0 : index
      %c0_65 = arith.constant 0 : index
      %69 = vector.load %arg6[%c0_63, %c0_64, %c0_65] : memref<1x8x1xf32, #tpu.memory_space<vmem>>, vector<1x8x1xf32>
      tpu.vector_store %arg6[%c0_63, %c0_64, %c0_65], %68 {strides = array<i32>} : memref<1x8x1xf32, #tpu.memory_space<vmem>>, vector<1x8x1xf32>,
      %cst_66 = arith.constant 0.000000e+00 : f32
      %70 = vector.broadcast %cst_66 : f32 to vector<1x8x1xf32>
      %c0_67 = arith.constant 0 : index
      %c0_68 = arith.constant 0 : index
      %c0_69 = arith.constant 0 : index
      %71 = vector.load %arg7[%c0_67, %c0_68, %c0_69] : memref<1x8x1xf32, #tpu.memory_space<vmem>>, vector<1x8x1xf32>
      tpu.vector_store %arg7[%c0_67, %c0_68, %c0_69], %70 {strides = array<i32>} : memref<1x8x1xf32, #tpu.memory_space<vmem>>, vector<1x8x1xf32>,
    } else {
    }
    %c0 = arith.constant 0 : index
    %c0_1 = arith.constant 0 : index
    %3 = vector.load %arg3[%c0, %c0_1] : memref<4x384xbf16, #tpu.memory_space<vmem>>, vector<4x384xbf16>
    %c0_2 = arith.constant 0 : index
    %c0_3 = arith.constant 0 : index
    %4 = vector.load %arg8[%c0_2, %c0_3] : memref<4x512xbf16, #tpu.memory_space<vmem>>, vector<4x384xbf16>
    tpu.vector_store %arg8[%c0_2, %c0_3], %3 {strides = array<i32>} : memref<4x512xbf16, #tpu.memory_space<vmem>>, vector<4x384xbf16>,
    %c0_4 = arith.constant 0 : index
    %c0_5 = arith.constant 0 : index
    %5 = vector.load %arg4[%c0_4, %c0_5] : memref<4x128xbf16, #tpu.memory_space<vmem>>, vector<4x128xbf16>
    %c0_6 = arith.constant 0 : index
    %c384 = arith.constant 384 : index
    %6 = vector.load %arg8[%c0_6, %c384] : memref<4x512xbf16, #tpu.memory_space<vmem>>, vector<4x128xbf16>
    tpu.vector_store %arg8[%c0_6, %c384], %5 {strides = array<i32>} : memref<4x512xbf16, #tpu.memory_space<vmem>>, vector<4x128xbf16>,
    %c0_7 = arith.constant 0 : index
    %c0_8 = arith.constant 0 : index
    %c0_9 = arith.constant 0 : index
    %7 = vector.load %arg2[%c0_7, %c0_8, %c0_9] : memref<9x8x4xbf16, #tpu.memory_space<vmem>>, vector<1x8x4xbf16>
    %8 = vector.shape_cast %7 : vector<1x8x4xbf16> to vector<8x4xbf16>
    %c0_10 = arith.constant 0 : index
    %c0_11 = arith.constant 0 : index
    %9 = vector.load %arg8[%c0_10, %c0_11] : memref<4x512xbf16, #tpu.memory_space<vmem>>, vector<4x384xbf16>
    %cst = arith.constant dense<0.000000e+00> : vector<8x384xf32>
    %10 = tpu.matmul %8, %9, %cst {dimension_numbers = #tpu.dot_dimension_numbers<[1], [0], [0], [1], [0, 0, 1, 1], [], []>} : vector<8x4xbf16>, vector<4x384xbf16>, vector<8x384xf32> -> vector<8x384xf32>
    %c1 = arith.constant 1 : index
    %c0_12 = arith.constant 0 : index
    %c0_13 = arith.constant 0 : index
    %11 = vector.load %arg2[%c1, %c0_12, %c0_13] : memref<9x8x4xbf16, #tpu.memory_space<vmem>>, vector<1x8x4xbf16>
    %12 = vector.shape_cast %11 : vector<1x8x4xbf16> to vector<8x4xbf16>
    %c0_14 = arith.constant 0 : index
    %c1_15 = arith.constant 1 : index
    %13 = vector.load %arg8[%c0_14, %c1_15] : memref<4x512xbf16, #tpu.memory_space<vmem>>, vector<4x384xbf16>
    %cst_16 = arith.constant dense<0.000000e+00> : vector<8x384xf32>
    %14 = tpu.matmul %12, %13, %cst_16 {dimension_numbers = #tpu.dot_dimension_numbers<[1], [0], [0], [1], [0, 0, 1, 1], [], []>} : vector<8x4xbf16>, vector<4x384xbf16>, vector<8x384xf32> -> vector<8x384xf32>
    %15 = arith.addf %10, %14 : vector<8x384xf32>
    %c2 = arith.constant 2 : index
    %c0_17 = arith.constant 0 : index
    %c0_18 = arith.constant 0 : index
    %16 = vector.load %arg2[%c2, %c0_17, %c0_18] : memref<9x8x4xbf16, #tpu.memory_space<vmem>>, vector<1x8x4xbf16>
    %17 = vector.shape_cast %16 : vector<1x8x4xbf16> to vector<8x4xbf16>
    %c0_19 = arith.constant 0 : index
    %c2_20 = arith.constant 2 : index
    %18 = vector.load %arg8[%c0_19, %c2_20] : memref<4x512xbf16, #tpu.memory_space<vmem>>, vector<4x384xbf16>
    %cst_21 = arith.constant dense<0.000000e+00> : vector<8x384xf32>
    %19 = tpu.matmul %17, %18, %cst_21 {dimension_numbers = #tpu.dot_dimension_numbers<[1], [0], [0], [1], [0, 0, 1, 1], [], []>} : vector<8x4xbf16>, vector<4x384xbf16>, vector<8x384xf32> -> vector<8x384xf32>
    %20 = arith.addf %15, %19 : vector<8x384xf32>
    %c3 = arith.constant 3 : index
    %c0_22 = arith.constant 0 : index
    %c0_23 = arith.constant 0 : index
    %21 = vector.load %arg2[%c3, %c0_22, %c0_23] : memref<9x8x4xbf16, #tpu.memory_space<vmem>>, vector<1x8x4xbf16>
    %22 = vector.shape_cast %21 : vector<1x8x4xbf16> to vector<8x4xbf16>
    %c0_24 = arith.constant 0 : index
    %c18 = arith.constant 18 : index
    %23 = vector.load %arg8[%c0_24, %c18] : memref<4x512xbf16, #tpu.memory_space<vmem>>, vector<4x384xbf16>
    %cst_25 = arith.constant dense<0.000000e+00> : vector<8x384xf32>
    %24 = tpu.matmul %22, %23, %cst_25 {dimension_numbers = #tpu.dot_dimension_numbers<[1], [0], [0], [1], [0, 0, 1, 1], [], []>} : vector<8x4xbf16>, vector<4x384xbf16>, vector<8x384xf32> -> vector<8x384xf32>
    %25 = arith.addf %20, %24 : vector<8x384xf32>
    %c4 = arith.constant 4 : index
    %c0_26 = arith.constant 0 : index
    %c0_27 = arith.constant 0 : index
    %26 = vector.load %arg2[%c4, %c0_26, %c0_27] : memref<9x8x4xbf16, #tpu.memory_space<vmem>>, vector<1x8x4xbf16>
    %27 = vector.shape_cast %26 : vector<1x8x4xbf16> to vector<8x4xbf16>
    %c0_28 = arith.constant 0 : index
    %c19 = arith.constant 19 : index
    %28 = vector.load %arg8[%c0_28, %c19] : memref<4x512xbf16, #tpu.memory_space<vmem>>, vector<4x384xbf16>
    %cst_29 = arith.constant dense<0.000000e+00> : vector<8x384xf32>
    %29 = tpu.matmul %27, %28, %cst_29 {dimension_numbers = #tpu.dot_dimension_numbers<[1], [0], [0], [1], [0, 0, 1, 1], [], []>} : vector<8x4xbf16>, vector<4x384xbf16>, vector<8x384xf32> -> vector<8x384xf32>
    %30 = arith.addf %25, %29 : vector<8x384xf32>
    %c5 = arith.constant 5 : index
    %c0_30 = arith.constant 0 : index
    %c0_31 = arith.constant 0 : index
    %31 = vector.load %arg2[%c5, %c0_30, %c0_31] : memref<9x8x4xbf16, #tpu.memory_space<vmem>>, vector<1x8x4xbf16>
    %32 = vector.shape_cast %31 : vector<1x8x4xbf16> to vector<8x4xbf16>
    %c0_32 = arith.constant 0 : index
    %c20 = arith.constant 20 : index
    %33 = vector.load %arg8[%c0_32, %c20] : memref<4x512xbf16, #tpu.memory_space<vmem>>, vector<4x384xbf16>
    %cst_33 = arith.constant dense<0.000000e+00> : vector<8x384xf32>
    %34 = tpu.matmul %32, %33, %cst_33 {dimension_numbers = #tpu.dot_dimension_numbers<[1], [0], [0], [1], [0, 0, 1, 1], [], []>} : vector<8x4xbf16>, vector<4x384xbf16>, vector<8x384xf32> -> vector<8x384xf32>
    %35 = arith.addf %30, %34 : vector<8x384xf32>
    %c6 = arith.constant 6 : index
    %c0_34 = arith.constant 0 : index
    %c0_35 = arith.constant 0 : index
    %36 = vector.load %arg2[%c6, %c0_34, %c0_35] : memref<9x8x4xbf16, #tpu.memory_space<vmem>>, vector<1x8x4xbf16>
    %37 = vector.shape_cast %36 : vector<1x8x4xbf16> to vector<8x4xbf16>
    %c0_36 = arith.constant 0 : index
    %c36 = arith.constant 36 : index
    %38 = vector.load %arg8[%c0_36, %c36] : memref<4x512xbf16, #tpu.memory_space<vmem>>, vector<4x384xbf16>
    %cst_37 = arith.constant dense<0.000000e+00> : vector<8x384xf32>
    %39 = tpu.matmul %37, %38, %cst_37 {dimension_numbers = #tpu.dot_dimension_numbers<[1], [0], [0], [1], [0, 0, 1, 1], [], []>} : vector<8x4xbf16>, vector<4x384xbf16>, vector<8x384xf32> -> vector<8x384xf32>
    %40 = arith.addf %35, %39 : vector<8x384xf32>
    %c7 = arith.constant 7 : index
    %c0_38 = arith.constant 0 : index
    %c0_39 = arith.constant 0 : index
    %41 = vector.load %arg2[%c7, %c0_38, %c0_39] : memref<9x8x4xbf16, #tpu.memory_space<vmem>>, vector<1x8x4xbf16>
    %42 = vector.shape_cast %41 : vector<1x8x4xbf16> to vector<8x4xbf16>
    %c0_40 = arith.constant 0 : index
    %c37 = arith.constant 37 : index
    %43 = vector.load %arg8[%c0_40, %c37] : memref<4x512xbf16, #tpu.memory_space<vmem>>, vector<4x384xbf16>
    %cst_41 = arith.constant dense<0.000000e+00> : vector<8x384xf32>
    %44 = tpu.matmul %42, %43, %cst_41 {dimension_numbers = #tpu.dot_dimension_numbers<[1], [0], [0], [1], [0, 0, 1, 1], [], []>} : vector<8x4xbf16>, vector<4x384xbf16>, vector<8x384xf32> -> vector<8x384xf32>
    %45 = arith.addf %40, %44 : vector<8x384xf32>
    %c8 = arith.constant 8 : index
    %c0_42 = arith.constant 0 : index
    %c0_43 = arith.constant 0 : index
    %46 = vector.load %arg2[%c8, %c0_42, %c0_43] : memref<9x8x4xbf16, #tpu.memory_space<vmem>>, vector<1x8x4xbf16>
    %47 = vector.shape_cast %46 : vector<1x8x4xbf16> to vector<8x4xbf16>
    %c0_44 = arith.constant 0 : index
    %c38 = arith.constant 38 : index
    %48 = vector.load %arg8[%c0_44, %c38] : memref<4x512xbf16, #tpu.memory_space<vmem>>, vector<4x384xbf16>
    %cst_45 = arith.constant dense<0.000000e+00> : vector<8x384xf32>
    %49 = tpu.matmul %47, %48, %cst_45 {dimension_numbers = #tpu.dot_dimension_numbers<[1], [0], [0], [1], [0, 0, 1, 1], [], []>} : vector<8x4xbf16>, vector<4x384xbf16>, vector<8x384xf32> -> vector<8x384xf32>
    %50 = arith.addf %45, %49 : vector<8x384xf32>
    %c0_46 = arith.constant 0 : index
    %c0_47 = arith.constant 0 : index
    %51 = vector.load %arg5[%c0_46, %c0_47] : memref<1x384xbf16, #tpu.memory_space<vmem>>, vector<1x384xbf16>
    %52 = arith.extf %51 : vector<1x384xbf16> to vector<1x384xf32>
    %53 = vector.broadcast %52 : vector<1x384xf32> to vector<8x384xf32>
    %54 = arith.mulf %50, %53 : vector<8x384xf32>
    %c0_48 = arith.constant 0 : index
    %c0_49 = arith.constant 0 : index
    %c0_50 = arith.constant 0 : index
    %55 = vector.load %arg6[%c0_48, %c0_49, %c0_50] : memref<1x8x1xf32, #tpu.memory_space<vmem>>, vector<1x8x1xf32>
    %cst_51 = arith.constant dense<0.000000e+00> : vector<8xf32>
    %56 = vector.multi_reduction <add>, %54, %cst_51 [1] : vector<8x384xf32> to vector<8xf32>
    %57 = vector.shape_cast %56 : vector<8xf32> to vector<8x1xf32>
    %58 = vector.shape_cast %57 : vector<8x1xf32> to vector<1x8x1xf32>
    %59 = arith.addf %55, %58 : vector<1x8x1xf32>
    %c0_52 = arith.constant 0 : index
    %c0_53 = arith.constant 0 : index
    %c0_54 = arith.constant 0 : index
    %60 = vector.load %arg6[%c0_52, %c0_53, %c0_54] : memref<1x8x1xf32, #tpu.memory_space<vmem>>, vector<1x8x1xf32>
    tpu.vector_store %arg6[%c0_52, %c0_53, %c0_54], %59 {strides = array<i32>} : memref<1x8x1xf32, #tpu.memory_space<vmem>>, vector<1x8x1xf32>,
    %c0_55 = arith.constant 0 : index
    %c0_56 = arith.constant 0 : index
    %c0_57 = arith.constant 0 : index
    %61 = vector.load %arg7[%c0_55, %c0_56, %c0_57] : memref<1x8x1xf32, #tpu.memory_space<vmem>>, vector<1x8x1xf32>
    %62 = arith.mulf %50, %54 : vector<8x384xf32>
    %cst_58 = arith.constant dense<0.000000e+00> : vector<8xf32>
    %63 = vector.multi_reduction <add>, %62, %cst_58 [1] : vector<8x384xf32> to vector<8xf32>
    %64 = vector.shape_cast %63 : vector<8xf32> to vector<8x1xf32>
    %65 = vector.shape_cast %64 : vector<8x1xf32> to vector<1x8x1xf32>
    %66 = arith.addf %61, %65 : vector<1x8x1xf32>
    %c0_59 = arith.constant 0 : index
    %c0_60 = arith.constant 0 : index
    %c0_61 = arith.constant 0 : index
    %67 = vector.load %arg7[%c0_59, %c0_60, %c0_61] : memref<1x8x1xf32, #tpu.memory_space<vmem>>, vector<1x8x1xf32>
    tpu.vector_store %arg7[%c0_59, %c0_60, %c0_61], %66 {strides = array<i32>} : memref<1x8x1xf32, #tpu.memory_space<vmem>>, vector<1x8x1xf32>,
    return
  }
  func.func @transform_0(%arg0: i32, %arg1: i32) -> (i32, i32, i32) {
    %c0_i32 = arith.constant 0 : i32
    %c0_i32_0 = arith.constant 0 : i32
    %c0_i32_1 = arith.constant 0 : i32
    %c0_i32_2 = arith.constant 0 : i32
    return %c0_i32, %c0_i32_0, %c0_i32_1 : i32, i32, i32
  }
  func.func @transform_1(%arg0: i32, %arg1: i32) -> (i32, i32) {
    %c1_i32 = arith.constant 1 : i32
    %0 = arith.muli %arg0, %c1_i32 : i32
    %1 = arith.addi %0, %arg1 : i32
    %c0_i32 = arith.constant 0 : i32
    %c0_i32_0 = arith.constant 0 : i32
    return %c0_i32, %1 : i32, i32
  }
  func.func @transform_2(%arg0: i32, %arg1: i32) -> (i32, i32) {
    %c1_i32 = arith.constant 1 : i32
    %0 = arith.muli %arg0, %c1_i32 : i32
    %1 = arith.addi %0, %arg1 : i32
    %c1_i32_0 = arith.constant 1 : i32
    %2 = arith.addi %1, %c1_i32_0 : i32
    %c3_i32 = arith.constant 3 : i32
    %3 = arith.muli %2, %c3_i32 : i32
    %c0_i32 = arith.constant 0 : i32
    %c0_i32_1 = arith.constant 0 : i32
    return %c0_i32, %3 : i32, i32
  }
  func.func @transform_3(%arg0: i32, %arg1: i32) -> (i32, i32) {
    %c1_i32 = arith.constant 1 : i32
    %0 = arith.muli %arg0, %c1_i32 : i32
    %1 = arith.addi %0, %arg1 : i32
    %c0_i32 = arith.constant 0 : i32
    %c0_i32_0 = arith.constant 0 : i32
    return %c0_i32, %1 : i32, i32
  }
  func.func @transform_4(%arg0: i32, %arg1: i32) -> (i32, i32, i32) {
    %c0_i32 = arith.constant 0 : i32
    %c0_i32_0 = arith.constant 0 : i32
    %c0_i32_1 = arith.constant 0 : i32
    return %arg0, %c0_i32, %c0_i32_0 : i32, i32, i32
  }
  func.func @transform_5(%arg0: i32, %arg1: i32) -> (i32, i32, i32) {
    %c0_i32 = arith.constant 0 : i32
    %c0_i32_0 = arith.constant 0 : i32
    %c0_i32_1 = arith.constant 0 : i32
    return %arg0, %c0_i32, %c0_i32_0 : i32, i32, i32
  }
}

module attributes {stable_mosaic.version = 11 : i64} {
  func.func @_bn_relu_kernel(%arg0: i32, %arg1: memref<9x8x4xbf16, #tpu.memory_space<vmem>>, %arg2: memref<8x1xf32, #tpu.memory_space<vmem>>, %arg3: memref<8x1xf32, #tpu.memory_space<vmem>>, %arg4: memref<4x384xbf16, #tpu.memory_space<vmem>>, %arg5: memref<4x128xbf16, #tpu.memory_space<vmem>>, %arg6: memref<8x384xf32, #tpu.memory_space<vmem>>, %arg7: memref<4x512xbf16, #tpu.memory_space<vmem>>) attributes {dimension_semantics = [#tpu.dimension_semantics<parallel>], iteration_bounds = array<i64: 2>, scalar_prefetch = 0 : i64, scratch_operands = 1 : i64, tpu.core_type = #tpu.core_type<tc>, window_params = [{pipeline_mode = #tpu.pipeline_mode<synchronous>, transform_indices = @transform_0, window_bounds = array<i64: 9, 8, 4>}, {pipeline_mode = #tpu.pipeline_mode<synchronous>, transform_indices = @transform_1, window_bounds = array<i64: 8, 1>}, {pipeline_mode = #tpu.pipeline_mode<synchronous>, transform_indices = @transform_2, window_bounds = array<i64: 8, 1>}, {transform_indices = @transform_3, window_bounds = array<i64: 4, 384>}, {transform_indices = @transform_4, window_bounds = array<i64: 4, 128>}, {transform_indices = @transform_5, window_bounds = array<i64: 8, 384>}]} {
    %c0 = arith.constant 0 : index
    %c0_0 = arith.constant 0 : index
    %0 = vector.load %arg4[%c0, %c0_0] : memref<4x384xbf16, #tpu.memory_space<vmem>>, vector<4x384xbf16>
    %c0_1 = arith.constant 0 : index
    %c0_2 = arith.constant 0 : index
    %1 = vector.load %arg7[%c0_1, %c0_2] : memref<4x512xbf16, #tpu.memory_space<vmem>>, vector<4x384xbf16>
    tpu.vector_store %arg7[%c0_1, %c0_2], %0 {strides = array<i32>} : memref<4x512xbf16, #tpu.memory_space<vmem>>, vector<4x384xbf16>,
    %c0_3 = arith.constant 0 : index
    %c0_4 = arith.constant 0 : index
    %2 = vector.load %arg5[%c0_3, %c0_4] : memref<4x128xbf16, #tpu.memory_space<vmem>>, vector<4x128xbf16>
    %c0_5 = arith.constant 0 : index
    %c384 = arith.constant 384 : index
    %3 = vector.load %arg7[%c0_5, %c384] : memref<4x512xbf16, #tpu.memory_space<vmem>>, vector<4x128xbf16>
    tpu.vector_store %arg7[%c0_5, %c384], %2 {strides = array<i32>} : memref<4x512xbf16, #tpu.memory_space<vmem>>, vector<4x128xbf16>,
    %c0_6 = arith.constant 0 : index
    %c0_7 = arith.constant 0 : index
    %c0_8 = arith.constant 0 : index
    %4 = vector.load %arg1[%c0_6, %c0_7, %c0_8] : memref<9x8x4xbf16, #tpu.memory_space<vmem>>, vector<1x8x4xbf16>
    %5 = vector.shape_cast %4 : vector<1x8x4xbf16> to vector<8x4xbf16>
    %c0_9 = arith.constant 0 : index
    %c0_10 = arith.constant 0 : index
    %6 = vector.load %arg7[%c0_9, %c0_10] : memref<4x512xbf16, #tpu.memory_space<vmem>>, vector<4x384xbf16>
    %cst = arith.constant dense<0.000000e+00> : vector<8x384xf32>
    %7 = tpu.matmul %5, %6, %cst {dimension_numbers = #tpu.dot_dimension_numbers<[1], [0], [0], [1], [0, 0, 1, 1], [], []>} : vector<8x4xbf16>, vector<4x384xbf16>, vector<8x384xf32> -> vector<8x384xf32>
    %c1 = arith.constant 1 : index
    %c0_11 = arith.constant 0 : index
    %c0_12 = arith.constant 0 : index
    %8 = vector.load %arg1[%c1, %c0_11, %c0_12] : memref<9x8x4xbf16, #tpu.memory_space<vmem>>, vector<1x8x4xbf16>
    %9 = vector.shape_cast %8 : vector<1x8x4xbf16> to vector<8x4xbf16>
    %c0_13 = arith.constant 0 : index
    %c1_14 = arith.constant 1 : index
    %10 = vector.load %arg7[%c0_13, %c1_14] : memref<4x512xbf16, #tpu.memory_space<vmem>>, vector<4x384xbf16>
    %cst_15 = arith.constant dense<0.000000e+00> : vector<8x384xf32>
    %11 = tpu.matmul %9, %10, %cst_15 {dimension_numbers = #tpu.dot_dimension_numbers<[1], [0], [0], [1], [0, 0, 1, 1], [], []>} : vector<8x4xbf16>, vector<4x384xbf16>, vector<8x384xf32> -> vector<8x384xf32>
    %12 = arith.addf %7, %11 : vector<8x384xf32>
    %c2 = arith.constant 2 : index
    %c0_16 = arith.constant 0 : index
    %c0_17 = arith.constant 0 : index
    %13 = vector.load %arg1[%c2, %c0_16, %c0_17] : memref<9x8x4xbf16, #tpu.memory_space<vmem>>, vector<1x8x4xbf16>
    %14 = vector.shape_cast %13 : vector<1x8x4xbf16> to vector<8x4xbf16>
    %c0_18 = arith.constant 0 : index
    %c2_19 = arith.constant 2 : index
    %15 = vector.load %arg7[%c0_18, %c2_19] : memref<4x512xbf16, #tpu.memory_space<vmem>>, vector<4x384xbf16>
    %cst_20 = arith.constant dense<0.000000e+00> : vector<8x384xf32>
    %16 = tpu.matmul %14, %15, %cst_20 {dimension_numbers = #tpu.dot_dimension_numbers<[1], [0], [0], [1], [0, 0, 1, 1], [], []>} : vector<8x4xbf16>, vector<4x384xbf16>, vector<8x384xf32> -> vector<8x384xf32>
    %17 = arith.addf %12, %16 : vector<8x384xf32>
    %c3 = arith.constant 3 : index
    %c0_21 = arith.constant 0 : index
    %c0_22 = arith.constant 0 : index
    %18 = vector.load %arg1[%c3, %c0_21, %c0_22] : memref<9x8x4xbf16, #tpu.memory_space<vmem>>, vector<1x8x4xbf16>
    %19 = vector.shape_cast %18 : vector<1x8x4xbf16> to vector<8x4xbf16>
    %c0_23 = arith.constant 0 : index
    %c18 = arith.constant 18 : index
    %20 = vector.load %arg7[%c0_23, %c18] : memref<4x512xbf16, #tpu.memory_space<vmem>>, vector<4x384xbf16>
    %cst_24 = arith.constant dense<0.000000e+00> : vector<8x384xf32>
    %21 = tpu.matmul %19, %20, %cst_24 {dimension_numbers = #tpu.dot_dimension_numbers<[1], [0], [0], [1], [0, 0, 1, 1], [], []>} : vector<8x4xbf16>, vector<4x384xbf16>, vector<8x384xf32> -> vector<8x384xf32>
    %22 = arith.addf %17, %21 : vector<8x384xf32>
    %c4 = arith.constant 4 : index
    %c0_25 = arith.constant 0 : index
    %c0_26 = arith.constant 0 : index
    %23 = vector.load %arg1[%c4, %c0_25, %c0_26] : memref<9x8x4xbf16, #tpu.memory_space<vmem>>, vector<1x8x4xbf16>
    %24 = vector.shape_cast %23 : vector<1x8x4xbf16> to vector<8x4xbf16>
    %c0_27 = arith.constant 0 : index
    %c19 = arith.constant 19 : index
    %25 = vector.load %arg7[%c0_27, %c19] : memref<4x512xbf16, #tpu.memory_space<vmem>>, vector<4x384xbf16>
    %cst_28 = arith.constant dense<0.000000e+00> : vector<8x384xf32>
    %26 = tpu.matmul %24, %25, %cst_28 {dimension_numbers = #tpu.dot_dimension_numbers<[1], [0], [0], [1], [0, 0, 1, 1], [], []>} : vector<8x4xbf16>, vector<4x384xbf16>, vector<8x384xf32> -> vector<8x384xf32>
    %27 = arith.addf %22, %26 : vector<8x384xf32>
    %c5 = arith.constant 5 : index
    %c0_29 = arith.constant 0 : index
    %c0_30 = arith.constant 0 : index
    %28 = vector.load %arg1[%c5, %c0_29, %c0_30] : memref<9x8x4xbf16, #tpu.memory_space<vmem>>, vector<1x8x4xbf16>
    %29 = vector.shape_cast %28 : vector<1x8x4xbf16> to vector<8x4xbf16>
    %c0_31 = arith.constant 0 : index
    %c20 = arith.constant 20 : index
    %30 = vector.load %arg7[%c0_31, %c20] : memref<4x512xbf16, #tpu.memory_space<vmem>>, vector<4x384xbf16>
    %cst_32 = arith.constant dense<0.000000e+00> : vector<8x384xf32>
    %31 = tpu.matmul %29, %30, %cst_32 {dimension_numbers = #tpu.dot_dimension_numbers<[1], [0], [0], [1], [0, 0, 1, 1], [], []>} : vector<8x4xbf16>, vector<4x384xbf16>, vector<8x384xf32> -> vector<8x384xf32>
    %32 = arith.addf %27, %31 : vector<8x384xf32>
    %c6 = arith.constant 6 : index
    %c0_33 = arith.constant 0 : index
    %c0_34 = arith.constant 0 : index
    %33 = vector.load %arg1[%c6, %c0_33, %c0_34] : memref<9x8x4xbf16, #tpu.memory_space<vmem>>, vector<1x8x4xbf16>
    %34 = vector.shape_cast %33 : vector<1x8x4xbf16> to vector<8x4xbf16>
    %c0_35 = arith.constant 0 : index
    %c36 = arith.constant 36 : index
    %35 = vector.load %arg7[%c0_35, %c36] : memref<4x512xbf16, #tpu.memory_space<vmem>>, vector<4x384xbf16>
    %cst_36 = arith.constant dense<0.000000e+00> : vector<8x384xf32>
    %36 = tpu.matmul %34, %35, %cst_36 {dimension_numbers = #tpu.dot_dimension_numbers<[1], [0], [0], [1], [0, 0, 1, 1], [], []>} : vector<8x4xbf16>, vector<4x384xbf16>, vector<8x384xf32> -> vector<8x384xf32>
    %37 = arith.addf %32, %36 : vector<8x384xf32>
    %c7 = arith.constant 7 : index
    %c0_37 = arith.constant 0 : index
    %c0_38 = arith.constant 0 : index
    %38 = vector.load %arg1[%c7, %c0_37, %c0_38] : memref<9x8x4xbf16, #tpu.memory_space<vmem>>, vector<1x8x4xbf16>
    %39 = vector.shape_cast %38 : vector<1x8x4xbf16> to vector<8x4xbf16>
    %c0_39 = arith.constant 0 : index
    %c37 = arith.constant 37 : index
    %40 = vector.load %arg7[%c0_39, %c37] : memref<4x512xbf16, #tpu.memory_space<vmem>>, vector<4x384xbf16>
    %cst_40 = arith.constant dense<0.000000e+00> : vector<8x384xf32>
    %41 = tpu.matmul %39, %40, %cst_40 {dimension_numbers = #tpu.dot_dimension_numbers<[1], [0], [0], [1], [0, 0, 1, 1], [], []>} : vector<8x4xbf16>, vector<4x384xbf16>, vector<8x384xf32> -> vector<8x384xf32>
    %42 = arith.addf %37, %41 : vector<8x384xf32>
    %c8 = arith.constant 8 : index
    %c0_41 = arith.constant 0 : index
    %c0_42 = arith.constant 0 : index
    %43 = vector.load %arg1[%c8, %c0_41, %c0_42] : memref<9x8x4xbf16, #tpu.memory_space<vmem>>, vector<1x8x4xbf16>
    %44 = vector.shape_cast %43 : vector<1x8x4xbf16> to vector<8x4xbf16>
    %c0_43 = arith.constant 0 : index
    %c38 = arith.constant 38 : index
    %45 = vector.load %arg7[%c0_43, %c38] : memref<4x512xbf16, #tpu.memory_space<vmem>>, vector<4x384xbf16>
    %cst_44 = arith.constant dense<0.000000e+00> : vector<8x384xf32>
    %46 = tpu.matmul %44, %45, %cst_44 {dimension_numbers = #tpu.dot_dimension_numbers<[1], [0], [0], [1], [0, 0, 1, 1], [], []>} : vector<8x4xbf16>, vector<4x384xbf16>, vector<8x384xf32> -> vector<8x384xf32>
    %47 = arith.addf %42, %46 : vector<8x384xf32>
    %c0_45 = arith.constant 0 : index
    %c0_46 = arith.constant 0 : index
    %48 = vector.load %arg2[%c0_45, %c0_46] : memref<8x1xf32, #tpu.memory_space<vmem>>, vector<8x1xf32>
    %49 = vector.broadcast %48 : vector<8x1xf32> to vector<8x384xf32>
    %50 = arith.mulf %47, %49 : vector<8x384xf32>
    %c0_47 = arith.constant 0 : index
    %c0_48 = arith.constant 0 : index
    %51 = vector.load %arg3[%c0_47, %c0_48] : memref<8x1xf32, #tpu.memory_space<vmem>>, vector<8x1xf32>
    %52 = vector.broadcast %51 : vector<8x1xf32> to vector<8x384xf32>
    %53 = arith.addf %50, %52 : vector<8x384xf32>
    %cst_49 = arith.constant 0.000000e+00 : f32
    %54 = vector.broadcast %cst_49 : f32 to vector<8x384xf32>
    %55 = arith.maximumf %53, %54 : vector<8x384xf32>
    %c0_50 = arith.constant 0 : index
    %c0_51 = arith.constant 0 : index
    %56 = vector.load %arg6[%c0_50, %c0_51] : memref<8x384xf32, #tpu.memory_space<vmem>>, vector<8x384xf32>
    tpu.vector_store %arg6[%c0_50, %c0_51], %55 {strides = array<i32>} : memref<8x384xf32, #tpu.memory_space<vmem>>, vector<8x384xf32>,
    return
  }
  func.func @transform_0(%arg0: i32) -> (i32, i32, i32) {
    %c0_i32 = arith.constant 0 : i32
    %c0_i32_0 = arith.constant 0 : i32
    %c0_i32_1 = arith.constant 0 : i32
    %c0_i32_2 = arith.constant 0 : i32
    return %c0_i32, %c0_i32_0, %c0_i32_1 : i32, i32, i32
  }
  func.func @transform_1(%arg0: i32) -> (i32, i32) {
    %c0_i32 = arith.constant 0 : i32
    %c0_i32_0 = arith.constant 0 : i32
    %c0_i32_1 = arith.constant 0 : i32
    return %c0_i32, %c0_i32_0 : i32, i32
  }
  func.func @transform_2(%arg0: i32) -> (i32, i32) {
    %c0_i32 = arith.constant 0 : i32
    %c0_i32_0 = arith.constant 0 : i32
    %c0_i32_1 = arith.constant 0 : i32
    return %c0_i32, %c0_i32_0 : i32, i32
  }
  func.func @transform_3(%arg0: i32) -> (i32, i32) {
    %c0_i32 = arith.constant 0 : i32
    %c0_i32_0 = arith.constant 0 : i32
    return %c0_i32, %arg0 : i32, i32
  }
  func.func @transform_4(%arg0: i32) -> (i32, i32) {
    %c1_i32 = arith.constant 1 : i32
    %0 = arith.addi %arg0, %c1_i32 : i32
    %c3_i32 = arith.constant 3 : i32
    %1 = arith.muli %0, %c3_i32 : i32
    %c0_i32 = arith.constant 0 : i32
    %c0_i32_0 = arith.constant 0 : i32
    return %c0_i32, %1 : i32, i32
  }
  func.func @transform_5(%arg0: i32) -> (i32, i32) {
    %c0_i32 = arith.constant 0 : i32
    %c0_i32_0 = arith.constant 0 : i32
    return %c0_i32, %arg0 : i32, i32
  }
}

</mosaic_0001>

<bundles_post_ra>
// kernel: block_forward.3
= control target key start
LH: loop header
LB: loop body
LE: loop exit
PB: predicated region body
PF: predicated region fallthrough
CT: control target
= control target key end

     0   :  { %s1774_s18 = smov 0   ;;  %s1943_s0 = inlined_call_operand.vmem [shape: bf16[9,8,4], index: 0, kind: input, shape index: {}]   ;;  %s1944_s1 = inlined_call_operand.vmem [shape: f32[8,1], index: 1, kind: input, shape index: {}]   ;;  %s1945_s2 = inlined_call_operand.vmem [shape: f32[8,1], index: 2, kind: input, shape index: {}]   ;;  %s1946_s3 = inlined_call_operand.vmem [shape: bf16[4,896], index: 3, kind: input, shape index: {}, may-alias: {3,4}]   ;;  %s1947_s4 = inlined_call_operand.vmem [shape: bf16[4,896], index: 4, kind: input, shape index: {}, may-alias: {3,4}]   ;;  %s1948_s5 = inlined_call_operand.vmem [shape: f32[8,768], index: 5, kind: output, shape index: {}]  }
   0x1 LB: > { %s1519_s19 = sadd.s32 4294967295, %s1730_s18   ;;  %p1523_p0 = scmp.ge.s32.totalorder %s1730_s18, 1  ;;  %s1730_s18 = sphi %s1774_s18, %s15_s18  }
   0x2   : > { %p213_p1 = scmp.lt.s32.totalorder %s1730_s18, 3 }
   0x4   : > { %p214_p2 = pnand %p1523_p0, %p213_p1 }
   0x5   : > { %s1782_s20 = smul.u32 (!%p214_p2), 3, %s1519_s19  ;;  %s265_s21 = sadd.s32 (!%p214_p2), 1, %s1519_s19  ;;  %v1732_v0 = vmov (!%p214_p2), 1983009808   ;;  %v294_v2 = vlaneseq (!%p214_p2)  ;;  %v1733_v8 = vmov (!%p214_p2), 0.0   ;;  %v1734_v9 = vmov (!%p214_p2), 0  }
   0x6   : > { %217 = sbr.rel (%p214_p2) target bundleno = 470 (0x1d6), region = 40  ;;  %v292_v1 = vunpack.c.l.s4 (!%p214_p2), %v1732_v0  ;;  %1582 = vmatprep.subr.bf16.mxu1 (!%p214_p2), %v1733_v8  ;;  %365 = vmatprep.mubr.bf16.mxu0 (!%p214_p2), %v1734_v9  ;;  %vm1735_vm0 = vmmov (!%p214_p2), 0   ;;  %s1736_s7 = smov (!%p214_p2), 127   ;;  %v1427_v16 = vld [vmem:[%s1944_s1] sm:$0xff] (!%p214_p2)  ;;  %vm315_vm1 = vcmask (!%p214_p2), 1039360   ;;  %vm323_vm2 = vcmask (!%p214_p2), 1041408  }
   0x7   : > { %s266_s22 = smul.u32 (!%p214_p2), 3, %s265_s21  ;;  %p256_p3 = scmp.lt.s32.totalorder (!%p214_p2), %s1782_s20, 6  ;;  %v295_v6 = vshrl.u32 (!%p214_p2), %v294_v2, 7  ;;  %1720 = vset.pattern.permute.xlu0 (!%p214_p2), %v1734_v9  ;;  %1721 = vset.pattern.permute.xlu1 (!%p214_p2), %v1734_v9  ;;  %v1436_v17 = vld [vmem:[%s1945_s2] sm:$0xff] (!%p214_p2)  ;;  %vm319_vm3 = vcmask (!%p214_p2), 31744   ;;  %vm553_vm4 = vcmask (!%p214_p2), 1031168  }
   0x8   : > { %v293_v5 = vunpack.c.0.s8 (!%p214_p2), %v292_v1  ;;  %1584 = vmatprep.mubr.msk.bf16.mxu1 (!%p214_p2), %vm1735_vm0, %v1733_v8  ;;  %s1737_s8 = smov (!%p214_p2), 126   ;;  %s1738_s9 = smov (!%p214_p2), 110   ;;  %v1527_v31 = vld [vmem:[%s1943_s0 + $0x4] sm:$0xf] (!%p214_p2)  ;;  %vm682_vm5 = vcmask (!%p214_p2), 900096   ;;  %vm811_vm6 = vcmask (!%p214_p2), 891904  }
   0x9   : > { %p267_p4 = scmp.lt.s32.totalorder (!%p214_p2), %s266_s22, 6  ;;  %s1739_s10 = smov (!%p214_p2), 109   ;;  %v284_v44 = vld [vmem:[%s1943_s0] sm:$0xf] (!%p214_p2)  ;;  %v1534_v55 = vld [vmem:[%s1943_s0 + $0x8] sm:$0xf] (!%p214_p2) }
   0xa   : > { %v1792_v7 = vsub.s32 (!%p214_p2), %v293_v5, %v295_v6  ;;  %s1740_s11 = smov (!%p214_p2), 108   ;;  %s1741_s12 = smov (!%p214_p2), 92   ;;  %vm940_vm7 = vcmask (!%p214_p2), 883712   ;;  %v1538_v1 = vld [vmem:[%s1943_s0 + $0xc] sm:$0xf] (!%p214_p2)  ;;  %vm1069_vm8 = vcmask (!%p214_p2), 752640  }
   0xb   : > { %s1742_s13 = smov (!%p214_p2), 91   ;;  %s1743_s14 = smov (!%p214_p2), 90   ;;  %vm1198_vm9 = vcmask (!%p214_p2), 744448   ;;  %vm1327_vm10 = vcmask (!%p214_p2), 736256  }
   0xc   : > { %p274_p5 = scmp.lt.s32.totalorder (!%p214_p2), %s1782_s20, 5 }
   0xd   : > { %s257_s23 = scalar_select %p256_p3, %s1782_s20, 6 }
   0xe   : > { %s1950_s22 = smov (!%p267_p4, %s266_s22), 6  ;;  %s1952_s20 = smov (!%p274_p5, %s1782_s20), 5 }
   0xf   : > { %s1524_s24 = sshll.u32 %s257_s23, 1  ;;  %s1525_s28 = sshll.u32 %s1950_s22, 1 }
  0x10   : > { %s259_s27 = scalar_lea.vmem %s1946_s3, %s1524_s24  ;;  %s270_s6 = scalar_lea.vmem %s1947_s4, %s1525_s28 }
  0x11   : > { %v280_v3 = vld [vmem:[%s259_s27] sm:$0x3f] }
  0x12   : > { %281 = vst [vmem:[#allocation2] sm:$0x3f] %v280_v3  ;;  %v282_v4 = vld [vmem:[%s270_s6] sm:$0x3] }
  0x13   : > { %283 = vst [vmem:[#allocation2 + $0x6] sm:$0x3] %v282_v4 }
  0x19   : > { %v285_v18 = vld [vmem:[#allocation2] sm:$0x3f] }
  0x1a   : > { %v288_v10 = vld [vmem:[#allocation2] sm:$0xff]  ;;  %v422_v20 = vrot.slane %v285_v18, %v1792_v7  ;;  %v415_v22 = vcombine.high %v285_v18, %v285_v18 }
  0x1b   : > { %v297_v11 = vrot.slane %v288_v10, %v1792_v7  ;;  %v290_v12 = vcombine.high %v288_v10, %v288_v10 }
  0x1c   : > { %v430_v24 = vcombine.high %v422_v20, %v422_v20  ;;  %v429_v29 = vrot.slane %v415_v22, %v1792_v7  ;;  %v435_v33 = vsel %vm323_vm2, %v422_v20, 0 }
  0x1d   : > { %307 = vrot.lane.b32.xlu0 %v297_v11, %s1736_s7  ;;  %v305_v13 = vcombine.high %v297_v11, %v297_v11  ;;  %v304_v14 = vrot.slane %v290_v12, %v1792_v7 }
  0x1e   : > { %v441_v35 = vsel %vm323_vm2, %v429_v29, 0 }
  0x1f   : > { %311 = vrot.lane.b32.xlu1 %v304_v14, %s1736_s7  ;;  %v306_v15 = vcombine.high %v304_v14, %v304_v14 }
  0x21   : > { %309 = vrot.lane.b32.xlu0 %v305_v13, %s1736_s7 }
  0x23   : > { %313 = vrot.lane.b32.xlu1 %v306_v15, %s1736_s7 }
  0x25   : > { %545 = vrot.lane.b32.xlu0 %v297_v11, %s1737_s8 }
  0x27   : > { %547 = vrot.lane.b32.xlu1 %v305_v13, %s1737_s8 }
  0x29   : > { %549 = vrot.lane.b32.xlu0 %v304_v14, %s1737_s8 }
  0x2b   : > { %551 = vrot.lane.b32.xlu1 %v306_v15, %s1737_s8 }
  0x2d   : > { %674 = vrot.lane.b32.xlu0 %v297_v11, %s1738_s9 }
  0x2f   : > { %676 = vrot.lane.b32.xlu1 %v305_v13, %s1738_s9 }
  0x31   : > { %678 = vrot.lane.b32.xlu0 %v304_v14, %s1738_s9 }
  0x33   : > { %680 = vrot.lane.b32.xlu1 %v306_v15, %s1738_s9 }
  0x35   : > { %803 = vrot.lane.b32.xlu0 %v297_v11, %s1739_s10 }
  0x37   : > { %805 = vrot.lane.b32.xlu1 %v305_v13, %s1739_s10 }
  0x39   : > { %807 = vrot.lane.b32.xlu0 %v304_v14, %s1739_s10 }
  0x3b   : > { %809 = vrot.lane.b32.xlu1 %v306_v15, %s1739_s10 }
  0x3d   : > { %932 = vrot.lane.b32.xlu0 %v297_v11, %s1740_s11 }
  0x3f   : > { %934 = vrot.lane.b32.xlu1 %v305_v13, %s1740_s11 }
  0x41   : > { %936 = vrot.lane.b32.xlu0 %v304_v14, %s1740_s11 }
  0x43   : > { %938 = vrot.lane.b32.xlu1 %v306_v15, %s1740_s11 }
  0x45   : > { %1061 = vrot.lane.b32.xlu0 %v297_v11, %s1741_s12 }
  0x47   : > { %1063 = vrot.lane.b32.xlu1 %v305_v13, %s1741_s12 }
  0x49   : > { %1065 = vrot.lane.b32.xlu0 %v304_v14, %s1741_s12 }
  0x4b   : > { %1067 = vrot.lane.b32.xlu1 %v306_v15, %s1741_s12 }
  0x4d   : > { %1190 = vrot.lane.b32.xlu0 %v297_v11, %s1742_s13 }
  0x4f   : > { %1192 = vrot.lane.b32.xlu1 %v305_v13, %s1742_s13 }
  0x51   : > { %1194 = vrot.lane.b32.xlu0 %v304_v14, %s1742_s13 }
  0x53   : > { %1196 = vrot.lane.b32.xlu1 %v306_v15, %s1742_s13 }
  0x55   : > { %1319 = vrot.lane.b32.xlu0 %v297_v11, %s1743_s14 }
  0x57   : > { %1321 = vrot.lane.b32.xlu1 %v305_v13, %s1743_s14  ;;  %v1542_v13 = vld [vmem:[%s1943_s0 + $0x10] sm:$0xf] }
  0x59   : > { %1323 = vrot.lane.b32.xlu0 %v304_v14, %s1743_s14 }
  0x5b   : > { %1325 = vrot.lane.b32.xlu1 %v306_v15, %s1743_s14  ;;  %s1526_s14 = sshll.u32 %s1952_s20, 3 }
  0x5c   : > { %s277_s17 = scalar_lea.vmem %s1948_s5, %s1526_s14 }
  0x5d   : > { %1430 = vperm.xlu0 %1720, %v1427_v16  }
  0x5f   : > { %1439 = vperm.xlu1 %1721, %v1436_v17  }
  0x8f   : > { %v308_v19 = vpop.permute.xlu0 %307 }
  0x91   : > { %v312_v21 = vpop.permute.xlu1 %311 }
  0x93   : > { %v310_v23 = vpop.permute.xlu0 %309 }
  0x94   : > { %v317_v25 = vsel %vm315_vm1, %v310_v23, %v312_v21  ;;  %v316_v26 = vsel %vm315_vm1, %v308_v19, %v310_v23  ;;  %v1546_v23 = vld [vmem:[%s1943_s0 + $0x14] sm:$0xf] }
  0x95   : > { %1528 = vmatprep.subr.msk.bf16.mxu0 %vm323_vm2, %v317_v25  ;;  %v314_v27 = vpop.permute.xlu1 %313  ;;  %v325_v28 = vsel %vm323_vm2, %v316_v26, 0 }
  0x96   : > { %334 = vmatpush1.bf16.msra.mxu0 %v325_v28  ;;  %v318_v30 = vsel %vm315_vm1, %v312_v21, %v314_v27 }
  0x97   : > { %v331_v32 = vsel %vm323_vm2, %v318_v30, 0  ;;  %1531 = vmatprep.subr.msk.bf16.mxu0 %vm323_vm2, %v430_v24  ;;  %v546_v34 = vpop.permute.xlu0 %545 }
  0x98   : > { %1583 = vmatpush3.bf16.msra.mxu1 %v331_v32 }
  0x99   : > { %1529 = vmatmul.mubr.msk.bf16.vlgmr.msra.gmra.mrb[0].mxu0 %vm319_vm3, %v1527_v31  ;;  %1588 = vmatprep.subr.bf16.mxu1 %v1733_v8  ;;  %v548_v36 = vpop.permute.xlu1 %547 }
  0x9a   : > { %444 = vmatpush1.bf16.msra.mxu0 %v435_v33  ;;  %475 = vmatprep.mubr.bf16.mxu0 %v1734_v9  ;;  %v554_v41 = vsel %vm553_vm4, %v546_v34, %v548_v36  ;;  %v1550_v33 = vld [vmem:[%s1943_s0 + $0x18] sm:$0xf] }
  0x9b   : > { %1585 = vmatmul.mubr.msk.bf16.vlgmr.msra.gmra.mrb[0].mxu1 %vm319_vm3, %v1527_v31  ;;  %v550_v37 = vpop.permute.xlu0 %549  ;;  %v561_v45 = vsel %vm323_vm2, %v554_v41, 0 }
  0x9c   : > { %1589 = vmatpush3.bf16.msra.mxu1 %v441_v35  ;;  %v555_v38 = vsel %vm553_vm4, %v548_v36, %v550_v37  ;;  %1590 = vmatprep.mubr.msk.bf16.mxu1 %vm1735_vm0, %v1733_v8 }
  0x9d   : > { %1535 = vmatprep.subr.msk.bf16.mxu0 %vm323_vm2, %v555_v38  ;;  %v552_v39 = vpop.permute.xlu1 %551  ;;  %1594 = vmatprep.subr.bf16.mxu1 %v1733_v8 }
  0x9e   : > { %v556_v43 = vsel %vm553_vm4, %v550_v37, %v552_v39 }
  0x9f   : > { %v675_v40 = vpop.permute.xlu0 %674  ;;  %v567_v48 = vsel %vm323_vm2, %v556_v43, 0  ;;  %v1558_v43 = vld [vmem:[%s1943_s0 + $0x20] sm:$0xf] }
  0xa1   : > { %v677_v42 = vpop.permute.xlu1 %676 }
  0xa2   : > { %v683_v51 = vsel %vm682_vm5, %v675_v40, %v677_v42  ;;  %v1554_v40 = vld [vmem:[%s1943_s0 + $0x1c] sm:$0xf] }
  0xa3   : > { %v679_v46 = vpop.permute.xlu0 %678  ;;  %v690_v56 = vsel %vm323_vm2, %v683_v51, 0 }
  0xa4   : > { %v684_v47 = vsel %vm682_vm5, %v677_v42, %v679_v46 }
  0xa5   : > { %1532 = vmatmul.mubr.msk.bf16.vlgmr.msra.gmra.mrb[0].mxu0 %vm319_vm3, %v284_v44  ;;  %v681_v50 = vpop.permute.xlu1 %680 }
  0xa6   : > { %570 = vmatpush1.bf16.msra.mxu0 %v561_v45  ;;  %601 = vmatprep.mubr.bf16.mxu0 %v1734_v9  ;;  %v685_v54 = vsel %vm682_vm5, %v679_v46, %v681_v50 }
  0xa7   : > { %1591 = vmatmul.mubr.msk.bf16.vlgmr.msra.gmra.mrb[0].mxu1 %vm319_vm3, %v284_v44  ;;  %1539 = vmatprep.subr.msk.bf16.mxu0 %vm323_vm2, %v684_v47  ;;  %v804_v49 = vpop.permute.xlu0 %803  ;;  %v696_v58 = vsel %vm323_vm2, %v685_v54, 0 }
  0xa8   : > { %1595 = vmatpush3.bf16.msra.mxu1 %v567_v48  ;;  %1596 = vmatprep.mubr.msk.bf16.mxu1 %vm1735_vm0, %v1733_v8 }
  0xa9   : > { %1600 = vmatprep.subr.bf16.mxu1 %v1733_v8  ;;  %v806_v52 = vpop.permute.xlu1 %805 }
  0xaa   : > { %v812_v61 = vsel %vm811_vm6, %v804_v49, %v806_v52 }
  0xab   : > { %v808_v53 = vpop.permute.xlu0 %807  ;;  %v819_v2 = vsel %vm323_vm2, %v812_v61, 0 }
  0xac   : > { %v813_v57 = vsel %vm811_vm6, %v806_v52, %v808_v53 }
  0xad   : > { %v810_v60 = vpop.permute.xlu1 %809 }
  0xae   : > { %v814_v0 = vsel %vm811_vm6, %v808_v53, %v810_v60 }
  0xaf   : > { %v933_v59 = vpop.permute.xlu0 %932  ;;  %v825_v4 = vsel %vm323_vm2, %v814_v0, 0 }
  0xb1   : > { %1536 = vmatmul.mubr.msk.bf16.vlgmr.msra.gmra.mrb[0].mxu0 %vm319_vm3, %v1534_v55  ;;  %v935_v62 = vpop.permute.xlu1 %934 }
  0xb2   : > { %699 = vmatpush1.bf16.msra.mxu0 %v690_v56  ;;  %730 = vmatprep.mubr.bf16.mxu0 %v1734_v9  ;;  %v941_v7 = vsel %vm940_vm7, %v933_v59, %v935_v62 }
  0xb3   : > { %1597 = vmatmul.mubr.msk.bf16.vlgmr.msra.gmra.mrb[0].mxu1 %vm319_vm3, %v1534_v55  ;;  %1543 = vmatprep.subr.msk.bf16.mxu0 %vm323_vm2, %v813_v57  ;;  %v937_v63 = vpop.permute.xlu0 %936  ;;  %v948_v14 = vsel %vm323_vm2, %v941_v7, 0 }
  0xb4   : > { %1601 = vmatpush3.bf16.msra.mxu1 %v696_v58  ;;  %1602 = vmatprep.mubr.msk.bf16.mxu1 %vm1735_vm0, %v1733_v8  ;;  %v942_v3 = vsel %vm940_vm7, %v935_v62, %v937_v63 }
  0xb5   : > { %1606 = vmatprep.subr.bf16.mxu1 %v1733_v8  ;;  %v939_v6 = vpop.permute.xlu1 %938 }
  0xb6   : > { %v943_v12 = vsel %vm940_vm7, %v937_v63, %v939_v6 }
  0xb7   : > { %v1062_v5 = vpop.permute.xlu0 %1061  ;;  %v954_v16 = vsel %vm323_vm2, %v943_v12, 0 }
  0xb9   : > { %v1064_v10 = vpop.permute.xlu1 %1063 }
  0xba   : > { %v1070_v19 = vsel %vm1069_vm8, %v1062_v5, %v1064_v10 }
  0xbb   : > { %v1066_v11 = vpop.permute.xlu0 %1065  ;;  %v1077_v24 = vsel %vm323_vm2, %v1070_v19, 0 }
  0xbc   : > { %v1071_v15 = vsel %vm1069_vm8, %v1064_v10, %v1066_v11 }
  0xbd   : > { %1540 = vmatmul.mubr.msk.bf16.vlgmr.msra.gmra.mrb[0].mxu0 %vm319_vm3, %v1538_v1  ;;  %v1068_v18 = vpop.permute.xlu1 %1067 }
  0xbe   : > { %828 = vmatpush1.bf16.msra.mxu0 %v819_v2  ;;  %859 = vmatprep.mubr.bf16.mxu0 %v1734_v9  ;;  %v1072_v22 = vsel %vm1069_vm8, %v1066_v11, %v1068_v18 }
  0xbf   : > { %1603 = vmatmul.mubr.msk.bf16.vlgmr.msra.gmra.mrb[0].mxu1 %vm319_vm3, %v1538_v1  ;;  %1547 = vmatprep.subr.msk.bf16.mxu0 %vm323_vm2, %v942_v3  ;;  %v1191_v17 = vpop.permute.xlu0 %1190  ;;  %v1083_v26 = vsel %vm323_vm2, %v1072_v22, 0 }
  0xc0   : > { %1607 = vmatpush3.bf16.msra.mxu1 %v825_v4  ;;  %1608 = vmatprep.mubr.msk.bf16.mxu1 %vm1735_vm0, %v1733_v8 }
  0xc1   : > { %1612 = vmatprep.subr.bf16.mxu1 %v1733_v8  ;;  %v1193_v20 = vpop.permute.xlu1 %1192 }
  0xc2   : > { %v1199_v29 = vsel %vm1198_vm9, %v1191_v17, %v1193_v20 }
  0xc3   : > { %v1195_v21 = vpop.permute.xlu0 %1194  ;;  %v1206_v34 = vsel %vm323_vm2, %v1199_v29, 0 }
  0xc4   : > { %v1200_v25 = vsel %vm1198_vm9, %v1193_v20, %v1195_v21 }
  0xc5   : > { %v1197_v28 = vpop.permute.xlu1 %1196 }
  0xc6   : > { %v1201_v32 = vsel %vm1198_vm9, %v1195_v21, %v1197_v28 }
  0xc7   : > { %v1320_v27 = vpop.permute.xlu0 %1319  ;;  %v1212_v36 = vsel %vm323_vm2, %v1201_v32, 0 }
  0xc9   : > { %1544 = vmatmul.mubr.msk.bf16.vlgmr.msra.gmra.mrb[0].mxu0 %vm319_vm3, %v1542_v13  ;;  %v1322_v30 = vpop.permute.xlu1 %1321 }
  0xca   : > { %957 = vmatpush1.bf16.msra.mxu0 %v948_v14  ;;  %988 = vmatprep.mubr.bf16.mxu0 %v1734_v9  ;;  %v1328_v38 = vsel %vm1327_vm10, %v1320_v27, %v1322_v30 }
  0xcb   : > { %1609 = vmatmul.mubr.msk.bf16.vlgmr.msra.gmra.mrb[0].mxu1 %vm319_vm3, %v1542_v13  ;;  %1551 = vmatprep.subr.msk.bf16.mxu0 %vm323_vm2, %v1071_v15  ;;  %v1324_v31 = vpop.permute.xlu0 %1323  ;;  %v1335_v41 = vsel %vm323_vm2, %v1328_v38, 0 }
  0xcc   : > { %1613 = vmatpush3.bf16.msra.mxu1 %v954_v16  ;;  %1614 = vmatprep.mubr.msk.bf16.mxu1 %vm1735_vm0, %v1733_v8  ;;  %v1329_v35 = vsel %vm1327_vm10, %v1322_v30, %v1324_v31 }
  0xcd   : > { %1618 = vmatprep.subr.bf16.mxu1 %v1733_v8  ;;  %v1326_v37 = vpop.permute.xlu1 %1325 }
  0xce   : > { %v1330_v39 = vsel %vm1327_vm10, %v1324_v31, %v1326_v37 }
  0xcf   : > { %v1341_v42 = vsel %vm323_vm2, %v1330_v39, 0 }
  0xd5   : > { %1548 = vmatmul.mubr.msk.bf16.vlgmr.msra.gmra.mrb[0].mxu0 %vm319_vm3, %v1546_v23 }
  0xd6   : > { %1086 = vmatpush1.bf16.msra.mxu0 %v1077_v24  ;;  %1117 = vmatprep.mubr.bf16.mxu0 %v1734_v9 }
  0xd7   : > { %1615 = vmatmul.mubr.msk.bf16.vlgmr.msra.gmra.mrb[0].mxu1 %vm319_vm3, %v1546_v23  ;;  %1555 = vmatprep.subr.msk.bf16.mxu0 %vm323_vm2, %v1200_v25 }
  0xd8   : > { %1619 = vmatpush3.bf16.msra.mxu1 %v1083_v26  ;;  %1620 = vmatprep.mubr.msk.bf16.mxu1 %vm1735_vm0, %v1733_v8 }
  0xd9   : > { %1624 = vmatprep.subr.bf16.mxu1 %v1733_v8 }
  0xdc   : > { %v1431_v44 = vpop.permute.xlu0 %1430 }
  0xde   : > { %v1440_v46 = vpop.permute.xlu1 %1439 }
  0xe1   : > { %1552 = vmatmul.mubr.msk.bf16.vlgmr.msra.gmra.mrb[0].mxu0 %vm319_vm3, %v1550_v33 }
  0xe2   : > { %1215 = vmatpush1.bf16.msra.mxu0 %v1206_v34  ;;  %1246 = vmatprep.mubr.bf16.mxu0 %v1734_v9 }
  0xe3   : > { %1621 = vmatmul.mubr.msk.bf16.vlgmr.msra.gmra.mrb[0].mxu1 %vm319_vm3, %v1550_v33  ;;  %1559 = vmatprep.subr.msk.bf16.mxu0 %vm323_vm2, %v1329_v35 }
  0xe4   : > { %1625 = vmatpush3.bf16.msra.mxu1 %v1212_v36  ;;  %1626 = vmatprep.mubr.msk.bf16.mxu1 %vm1735_vm0, %v1733_v8 }
  0xe5   : > { %1630 = vmatprep.subr.bf16.mxu1 %v1733_v8 }
  0xed   : > { %1556 = vmatmul.mubr.msk.bf16.vlgmr.msra.gmra.mrb[0].mxu0 %vm319_vm3, %v1554_v40 }
  0xee   : > { %1344 = vmatpush1.bf16.msra.mxu0 %v1335_v41  ;;  %1375 = vmatprep.mubr.bf16.mxu0 %v1734_v9 }
  0xef   : > { %1627 = vmatmul.mubr.msk.bf16.vlgmr.msra.gmra.mrb[0].mxu1 %vm319_vm3, %v1554_v40 }
  0xf0   : > { %1631 = vmatpush3.bf16.msra.mxu1 %v1341_v42  ;;  %1632 = vmatprep.mubr.msk.bf16.mxu1 %vm1735_vm0, %v1733_v8 }
  0xf9   : > { %1560 = vmatmul.mubr.msk.bf16.vlgmr.msra.gmra.mrb[0].mxu0 %vm319_vm3, %v1558_v43 }
  0xfb   : > { %1633 = vmatmul.mubr.msk.bf16.vlgmr.msra.gmra.mrb[0].mxu1 %vm319_vm3, %v1558_v43 }
 0x1cc   : > { %v1377_v45 = vpop.f32.mrb[0].mxu0 }
 0x1cd   : > { %v1433_v9 = vmul.f32 %v1431_v44, %v1377_v45  ;;  %v1379_v47 = vpop.f32.mrb[1].mxu0 }
 0x1ce   : > { %v1434_v48 = vmul.f32 %v1431_v44, %v1379_v47  ;;  %v1381_v49 = vpop.f32.mrb[2].mxu0  ;;  %v1418_v50 = vpop.f32.mrb[0].mxu1 }
 0x1cf   : > { %v1442_v8 = vadd.f32 %v1440_v46, %v1433_v9  ;;  %v1435_v51 = vmul.f32 %v1431_v44, %v1418_v50  ;;  %v1382_v52 = vpop.f32.mrb[3].mxu0  ;;  %v1634_v53 = vpop.f32.mrb[1].mxu1 }
 0x1d0   : > { %v1443_v54 = vadd.f32 %v1440_v46, %v1434_v48  ;;  %v1421_v55 = vpop.f32.mrb[2].mxu1 }
 0x1d1   : > { %v1445_v56 = vmax.f32 %v1442_v8, 0.0  ;;  %v1444_v57 = vadd.f32 %v1440_v46, %v1435_v51  ;;  %v1635_v58 = vpop.f32.mrb[3].mxu1 }
 0x1d2   : > { %v1446_v59 = vmax.f32 %v1443_v54, 0.0 }
 0x1d3   : > { %1448 = vst [vmem:[%s277_s17] sm:$0xff] %v1445_v56  ;;  %v1447_v60 = vmax.f32 %v1444_v57, 0.0 }
 0x1d4   : > { %1449 = vst [vmem:[%s277_s17 + $0x8] sm:$0xff] %v1446_v59 }
 0x1d5   : > { %1450 = vst [vmem:[%s277_s17 + $0x10] sm:$0xff] %v1447_v60 }
 0x1d6 PF: > { %s15_s18 = sadd.s32 1, %s1730_s18  }
 0x1d7   : > { %p12_p6 = scmp.ge.s32.totalorder %s15_s18, 4  }
 0x1d9   :  { %14 = sbr.rel (!%p12_p6) target bundleno = 1 (0x1), region = 81 }

// kernel: block_forward.2
= control target key start
LH: loop header
LB: loop body
LE: loop exit
PB: predicated region body
PF: predicated region fallthrough
CT: control target
= control target key end

     0   :  { %s1944_s18 = smov 0   ;;  %s1946_s19 = smov 0   ;;  %s2157_s0 = inlined_call_operand.vmem [shape: bf16[9,8,4], index: 0, kind: input, shape index: {}]   ;;  %s2158_s1 = inlined_call_operand.vmem [shape: bf16[4,896], index: 1, kind: input, shape index: {}, may-alias: {1,2}]   ;;  %s2159_s2 = inlined_call_operand.vmem [shape: bf16[4,896], index: 2, kind: input, shape index: {}, may-alias: {1,2}]   ;;  %s2160_s3 = inlined_call_operand.vmem [shape: bf16[1,768], index: 3, kind: input, shape index: {}]   ;;  %s2161_s4 = inlined_call_operand.vmem [shape: f32[2,8,1], index: 4, kind: output, shape index: {0}]   ;;  %s2162_s5 = inlined_call_operand.vmem [shape: f32[2,8,1], index: 5, kind: output, shape index: {1}]  }
   0x1   :  { %s1948_s20 = smov 0  }
   0x2 LB: > { %s28_s21 = sadd.s32 1, %s1896_s19  ;;  %p1662_p0 = scmp.ge.s32.totalorder %s1900_s20, 1  ;;  %s1900_s20 = sphi %s1948_s20, %s16_s20   ;;  %s1896_s19 = sphi %s1946_s19, %s2164_s19   ;;  %s1892_s18 = sphi %s1944_s18, %s2163_s18  }
   0x3   : > { %p30_p1 = scmp.ge.s32.totalorder %s28_s21, 2  ;;  %p250_p2 = scmp.lt.s32.totalorder %s1900_s20, 3 }
   0x5   : > { %s2166_s21 = smov (%p30_p1, %s28_s21), 0  ;;  %p251_p3 = pnand %p1662_p0, %p250_p2 }
   0x6   : > { %s1965_s22 = smul.u32 (!%p251_p3), 3, %s1892_s18  ;;  %s315_s23 = sadd.s32 (!%p251_p3), 1, %s1892_s18  ;;  %v1902_v0 = vmov (!%p251_p3), 1983009808   ;;  %v361_v2 = vlaneseq (!%p251_p3)  ;;  %v1903_v8 = vmov (!%p251_p3), 0.0   ;;  %v1904_v9 = vmov (!%p251_p3), 0  }
   0x7   : > { %254 = sbr.rel (%p251_p3) target bundleno = 616 (0x268), region = 36  ;;  %v359_v1 = vunpack.c.l.s4 (!%p251_p3), %v1902_v0  ;;  %1722 = vmatprep.subr.bf16.mxu1 (!%p251_p3), %v1903_v8  ;;  %432 = vmatprep.mubr.bf16.mxu0 (!%p251_p3), %v1904_v9  ;;  %vm1905_vm0 = vmmov (!%p251_p3), 0   ;;  %s1906_s9 = smov (!%p251_p3), 127   ;;  %vm382_vm1 = vcmask (!%p251_p3), 1039360   ;;  %vm390_vm2 = vcmask (!%p251_p3), 1041408  }
   0x8   : > { %s316_s24 = smul.u32 (!%p251_p3), 3, %s315_s23  ;;  %p304_p4 = scmp.lt.s32.totalorder (!%p251_p3), %s1965_s22, 6  ;;  %v1976_v6 = vshrl.u32 (!%p251_p3), %v361_v2, 7  ;;  %1724 = vmatprep.mubr.msk.bf16.mxu1 (!%p251_p3), %vm1905_vm0, %v1903_v8  ;;  %v1667_v29 = vld [vmem:[%s2157_s0 + $0x4] sm:$0xf] (!%p251_p3)  ;;  %vm386_vm3 = vcmask (!%p251_p3), 31744  }
   0x9   : > { %v360_v5 = vunpack.c.0.s8 (!%p251_p3), %v359_v1  ;;  %s1907_s10 = smov (!%p251_p3), 126   ;;  %s1908_s11 = smov (!%p251_p3), 110   ;;  %vm620_vm4 = vcmask (!%p251_p3), 1031168   ;;  %vm749_vm5 = vcmask (!%p251_p3), 900096   ;;  %v351_v42 = vld [vmem:[%s2157_s0] sm:$0xf] (!%p251_p3) }
   0xa   : > { %p317_p5 = scmp.lt.s32.totalorder (!%p251_p3), %s316_s24, 6  ;;  %s1909_s12 = smov (!%p251_p3), 109   ;;  %vm878_vm6 = vcmask (!%p251_p3), 891904   ;;  %v1674_v53 = vld [vmem:[%s2157_s0 + $0x8] sm:$0xf] (!%p251_p3)  ;;  %vm1007_vm7 = vcmask (!%p251_p3), 883712  }
   0xb   : > { %v1979_v7 = vsub.s32 (!%p251_p3), %v360_v5, %v1976_v6  ;;  %s1910_s13 = smov (!%p251_p3), 108   ;;  %s1911_s14 = smov (!%p251_p3), 92   ;;  %v1678_v63 = vld [vmem:[%s2157_s0 + $0xc] sm:$0xf] (!%p251_p3)  ;;  %vm1136_vm8 = vcmask (!%p251_p3), 752640   ;;  %vm1265_vm9 = vcmask (!%p251_p3), 744448  }
   0xc   : > { %s1912_s15 = smov (!%p251_p3), 91   ;;  %s1913_s16 = smov (!%p251_p3), 90   ;;  %vm1394_vm10 = vcmask (!%p251_p3), 736256   ;;  %vm344_vm11 = vcmask (!%p251_p3), 7168  }
   0xd   : > { %p331_p6 = scmp.lt.s32.totalorder (!%p251_p3), %s1892_s18, 1  ;;  %p326_p7 = scmp.lt.s32.totalorder (!%p251_p3), %s1965_s22, 5 }
   0xe   : > { %s305_s25 = scalar_select %p304_p4, %s1965_s22, 6 }
   0xf   : > { %s2168_s24 = smov (!%p317_p5, %s316_s24), 6  ;;  %s2170_s18 = smov (!%p331_p6, %s1892_s18), 1 }
  0x10   : > { %s1663_s26 = sshll.u32 %s305_s25, 1  ;;  %s1664_s30 = sshll.u32 %s2168_s24, 1 }
  0x11   : > { %s307_s29 = scalar_lea.vmem %s2158_s1, %s1663_s26  ;;  %s320_s8 = scalar_lea.vmem %s2159_s2, %s1664_s30 }
  0x12   : > { %v347_v3 = vld [vmem:[%s307_s29] sm:$0x3f]  ;;  %s2172_s22 = smov (!%p326_p7, %s1965_s22), 5 }
  0x13   : > { %348 = vst [vmem:[#allocation2] sm:$0x3f] %v347_v3  ;;  %v349_v4 = vld [vmem:[%s320_s8] sm:$0x3]  ;;  %s328_s26 = scalar_lea.vmem %s2160_s3, %s2172_s22 }
  0x14   : > { %350 = vst [vmem:[#allocation2 + $0x6] sm:$0x3] %v349_v4 }
  0x1a   : > { %v352_v16 = vld [vmem:[#allocation2] sm:$0x3f] }
  0x1b   : > { %v355_v10 = vld [vmem:[#allocation2] sm:$0xff]  ;;  %v489_v18 = vrot.slane %v352_v16, %v1979_v7  ;;  %v482_v20 = vcombine.high %v352_v16, %v352_v16 }
  0x1c   : > { %v364_v11 = vrot.slane %v355_v10, %v1979_v7  ;;  %v357_v12 = vcombine.high %v355_v10, %v355_v10 }
  0x1d   : > { %v497_v22 = vcombine.high %v489_v18, %v489_v18  ;;  %v496_v27 = vrot.slane %v482_v20, %v1979_v7  ;;  %v502_v31 = vsel %vm390_vm2, %v489_v18, 0 }
  0x1e   : > { %374 = vrot.lane.b32.xlu0 %v364_v11, %s1906_s9  ;;  %v372_v13 = vcombine.high %v364_v11, %v364_v11  ;;  %v371_v14 = vrot.slane %v357_v12, %v1979_v7  ;;  %v1682_v12 = vld [vmem:[%s2157_s0 + $0x10] sm:$0xf] }
  0x1f   : > { %v508_v33 = vsel %vm390_vm2, %v496_v27, 0 }
  0x20   : > { %378 = vrot.lane.b32.xlu1 %v371_v14, %s1906_s9  ;;  %v373_v15 = vcombine.high %v371_v14, %v371_v14 }
  0x22   : > { %376 = vrot.lane.b32.xlu0 %v372_v13, %s1906_s9 }
  0x24   : > { %380 = vrot.lane.b32.xlu1 %v373_v15, %s1906_s9 }
  0x26   : > { %612 = vrot.lane.b32.xlu0 %v364_v11, %s1907_s10 }
  0x28   : > { %614 = vrot.lane.b32.xlu1 %v372_v13, %s1907_s10 }
  0x2a   : > { %616 = vrot.lane.b32.xlu0 %v371_v14, %s1907_s10 }
  0x2c   : > { %618 = vrot.lane.b32.xlu1 %v373_v15, %s1907_s10 }
  0x2e   : > { %741 = vrot.lane.b32.xlu0 %v364_v11, %s1908_s11 }
  0x30   : > { %743 = vrot.lane.b32.xlu1 %v372_v13, %s1908_s11 }
  0x32   : > { %745 = vrot.lane.b32.xlu0 %v371_v14, %s1908_s11 }
  0x34   : > { %747 = vrot.lane.b32.xlu1 %v373_v15, %s1908_s11 }
  0x36   : > { %870 = vrot.lane.b32.xlu0 %v364_v11, %s1909_s12 }
  0x38   : > { %872 = vrot.lane.b32.xlu1 %v372_v13, %s1909_s12 }
  0x3a   : > { %874 = vrot.lane.b32.xlu0 %v371_v14, %s1909_s12 }
  0x3c   : > { %876 = vrot.lane.b32.xlu1 %v373_v15, %s1909_s12 }
  0x3e   : > { %999 = vrot.lane.b32.xlu0 %v364_v11, %s1910_s13 }
  0x40   : > { %1001 = vrot.lane.b32.xlu1 %v372_v13, %s1910_s13 }
  0x42   : > { %1003 = vrot.lane.b32.xlu0 %v371_v14, %s1910_s13 }
  0x44   : > { %1005 = vrot.lane.b32.xlu1 %v373_v15, %s1910_s13 }
  0x46   : > { %1128 = vrot.lane.b32.xlu0 %v364_v11, %s1911_s14 }
  0x48   : > { %1130 = vrot.lane.b32.xlu1 %v372_v13, %s1911_s14 }
  0x4a   : > { %1132 = vrot.lane.b32.xlu0 %v371_v14, %s1911_s14 }
  0x4c   : > { %1134 = vrot.lane.b32.xlu1 %v373_v15, %s1911_s14 }
  0x4e   : > { %1257 = vrot.lane.b32.xlu0 %v364_v11, %s1912_s15 }
  0x50   : > { %1259 = vrot.lane.b32.xlu1 %v372_v13, %s1912_s15 }
  0x52   : > { %1261 = vrot.lane.b32.xlu0 %v371_v14, %s1912_s15 }
  0x54   : > { %1263 = vrot.lane.b32.xlu1 %v373_v15, %s1912_s15  ;;  %s1665_s15 = sshll.u32 %s2170_s18, 3 }
  0x55   : > { %s2124_s23 = scalar_lea.vmem %s2161_s4, %s1665_s15  ;;  %s338_s28 = scalar_lea.vmem %s2162_s5, %s1665_s15 }
  0x56   : > { %1386 = vrot.lane.b32.xlu0 %v364_v11, %s1913_s16  ;;  %345 = vst.msk [vmem:[%s2124_s23] sm:$0xff] %vm344_vm11, %v1903_v8  ;;  %346 = vst.msk [vmem:[%s338_s28] sm:$0xff] %vm344_vm11, %v1903_v8 }
  0x58   : > { %1388 = vrot.lane.b32.xlu1 %v372_v13, %s1913_s16 }
  0x5a   : > { %1390 = vrot.lane.b32.xlu0 %v371_v14, %s1913_s16 }
  0x5c   : > { %1392 = vrot.lane.b32.xlu1 %v373_v15, %s1913_s16 }
  0x90   : > { %v375_v17 = vpop.permute.xlu0 %374 }
  0x92   : > { %v379_v19 = vpop.permute.xlu1 %378 }
  0x94   : > { %v377_v21 = vpop.permute.xlu0 %376 }
  0x95   : > { %v384_v23 = vsel %vm382_vm1, %v377_v21, %v379_v19  ;;  %v383_v24 = vsel %vm382_vm1, %v375_v17, %v377_v21 }
  0x96   : > { %1668 = vmatprep.subr.msk.bf16.mxu0 %vm390_vm2, %v384_v23  ;;  %v381_v25 = vpop.permute.xlu1 %380  ;;  %v392_v26 = vsel %vm390_vm2, %v383_v24, 0 }
  0x97   : > { %401 = vmatpush1.bf16.msra.mxu0 %v392_v26  ;;  %v385_v28 = vsel %vm382_vm1, %v379_v19, %v381_v25 }
  0x98   : > { %v398_v30 = vsel %vm390_vm2, %v385_v28, 0  ;;  %1671 = vmatprep.subr.msk.bf16.mxu0 %vm390_vm2, %v497_v22  ;;  %v613_v32 = vpop.permute.xlu0 %612  ;;  %v1686_v22 = vld [vmem:[%s2157_s0 + $0x14] sm:$0xf] }
  0x99   : > { %1723 = vmatpush3.bf16.msra.mxu1 %v398_v30 }
  0x9a   : > { %1669 = vmatmul.mubr.msk.bf16.vlgmr.msra.gmra.mrb[0].mxu0 %vm386_vm3, %v1667_v29  ;;  %1728 = vmatprep.subr.bf16.mxu1 %v1903_v8  ;;  %v615_v34 = vpop.permute.xlu1 %614 }
  0x9b   : > { %511 = vmatpush1.bf16.msra.mxu0 %v502_v31  ;;  %542 = vmatprep.mubr.bf16.mxu0 %v1904_v9  ;;  %v621_v39 = vsel %vm620_vm4, %v613_v32, %v615_v34  ;;  %v1690_v32 = vld [vmem:[%s2157_s0 + $0x18] sm:$0xf] }
  0x9c   : > { %1725 = vmatmul.mubr.msk.bf16.vlgmr.msra.gmra.mrb[0].mxu1 %vm386_vm3, %v1667_v29  ;;  %v617_v35 = vpop.permute.xlu0 %616  ;;  %v628_v43 = vsel %vm390_vm2, %v621_v39, 0  ;;  %v1694_v39 = vld [vmem:[%s2157_s0 + $0x1c] sm:$0xf] }
  0x9d   : > { %1729 = vmatpush3.bf16.msra.mxu1 %v508_v33  ;;  %v622_v36 = vsel %vm620_vm4, %v615_v34, %v617_v35  ;;  %1730 = vmatprep.mubr.msk.bf16.mxu1 %vm1905_vm0, %v1903_v8 }
  0x9e   : > { %v619_v37 = vpop.permute.xlu1 %618  ;;  %1675 = vmatprep.subr.msk.bf16.mxu0 %vm390_vm2, %v622_v36  ;;  %1734 = vmatprep.subr.bf16.mxu1 %v1903_v8 }
  0x9f   : > { %v623_v41 = vsel %vm620_vm4, %v617_v35, %v619_v37 }
  0xa0   : > { %v742_v38 = vpop.permute.xlu0 %741  ;;  %v634_v46 = vsel %vm390_vm2, %v623_v41, 0 }
  0xa2   : > { %v744_v40 = vpop.permute.xlu1 %743 }
  0xa3   : > { %v750_v49 = vsel %vm749_vm5, %v742_v38, %v744_v40 }
  0xa4   : > { %v746_v44 = vpop.permute.xlu0 %745  ;;  %v757_v54 = vsel %vm390_vm2, %v750_v49, 0 }
  0xa5   : > { %v751_v45 = vsel %vm749_vm5, %v744_v40, %v746_v44 }
  0xa6   : > { %1672 = vmatmul.mubr.msk.bf16.vlgmr.msra.gmra.mrb[0].mxu0 %vm386_vm3, %v351_v42  ;;  %v748_v48 = vpop.permute.xlu1 %747 }
  0xa7   : > { %637 = vmatpush1.bf16.msra.mxu0 %v628_v43  ;;  %668 = vmatprep.mubr.bf16.mxu0 %v1904_v9  ;;  %v752_v52 = vsel %vm749_vm5, %v746_v44, %v748_v48  ;;  %v1499_v44 = vsub.s32 0, %v1976_v6 }
  0xa8   : > { %1731 = vmatmul.mubr.msk.bf16.vlgmr.msra.gmra.mrb[0].mxu1 %vm386_vm3, %v351_v42  ;;  %1679 = vmatprep.subr.msk.bf16.mxu0 %vm390_vm2, %v751_v45  ;;  %v871_v47 = vpop.permute.xlu0 %870  ;;  %v763_v56 = vsel %vm390_vm2, %v752_v52, 0  ;;  %v1698_v42 = vld [vmem:[%s2157_s0 + $0x20] sm:$0xf]  ;;  %v1503_v45 = vsub.s32 2, %v1976_v6 }
  0xa9   : > { %1735 = vmatpush3.bf16.msra.mxu1 %v634_v46  ;;  %1736 = vmatprep.mubr.msk.bf16.mxu1 %vm1905_vm0, %v1903_v8  ;;  %v1507_v46 = vsub.s32 4, %v1976_v6 }
  0xaa   : > { %1740 = vmatprep.subr.bf16.mxu1 %v1903_v8  ;;  %v873_v50 = vpop.permute.xlu1 %872 }
  0xab   : > { %v879_v59 = vsel %vm878_vm6, %v871_v47, %v873_v50 }
  0xac   : > { %v875_v51 = vpop.permute.xlu0 %874  ;;  %v886_v0 = vsel %vm390_vm2, %v879_v59, 0 }
  0xad   : > { %v880_v55 = vsel %vm878_vm6, %v873_v50, %v875_v51 }
  0xae   : > { %v877_v58 = vpop.permute.xlu1 %876 }
  0xaf   : > { %v881_v62 = vsel %vm878_vm6, %v875_v51, %v877_v58 }
  0xb0   : > { %v1000_v57 = vpop.permute.xlu0 %999  ;;  %v892_v2 = vsel %vm390_vm2, %v881_v62, 0 }
  0xb2   : > { %1676 = vmatmul.mubr.msk.bf16.vlgmr.msra.gmra.mrb[0].mxu0 %vm386_vm3, %v1674_v53  ;;  %v1002_v60 = vpop.permute.xlu1 %1001 }
  0xb3   : > { %766 = vmatpush1.bf16.msra.mxu0 %v757_v54  ;;  %797 = vmatprep.mubr.bf16.mxu0 %v1904_v9  ;;  %v1008_v5 = vsel %vm1007_vm7, %v1000_v57, %v1002_v60 }
  0xb4   : > { %1737 = vmatmul.mubr.msk.bf16.vlgmr.msra.gmra.mrb[0].mxu1 %vm386_vm3, %v1674_v53  ;;  %1683 = vmatprep.subr.msk.bf16.mxu0 %vm390_vm2, %v880_v55  ;;  %v1004_v61 = vpop.permute.xlu0 %1003  ;;  %v1015_v13 = vsel %vm390_vm2, %v1008_v5, 0 }
  0xb5   : > { %1741 = vmatpush3.bf16.msra.mxu1 %v763_v56  ;;  %1742 = vmatprep.mubr.msk.bf16.mxu1 %vm1905_vm0, %v1903_v8  ;;  %v1009_v1 = vsel %vm1007_vm7, %v1002_v60, %v1004_v61 }
  0xb6   : > { %1746 = vmatprep.subr.bf16.mxu1 %v1903_v8  ;;  %v1006_v4 = vpop.permute.xlu1 %1005 }
  0xb7   : > { %v1010_v11 = vsel %vm1007_vm7, %v1004_v61, %v1006_v4 }
  0xb8   : > { %v1129_v3 = vpop.permute.xlu0 %1128  ;;  %v1021_v15 = vsel %vm390_vm2, %v1010_v11, 0  ;;  %v1535_v11 = vld [vmem:[%s338_s28] sm:$0xff] }
  0xba   : > { %v1131_v7 = vpop.permute.xlu1 %1130 }
  0xbb   : > { %v1137_v18 = vsel %vm1136_vm8, %v1129_v3, %v1131_v7 }
  0xbc   : > { %v1133_v10 = vpop.permute.xlu0 %1132  ;;  %v1144_v23 = vsel %vm390_vm2, %v1137_v18, 0 }
  0xbd   : > { %v1138_v14 = vsel %vm1136_vm8, %v1131_v7, %v1133_v10  ;;  %v1527_v7 = vld [vmem:[%s2124_s23] sm:$0xff] }
  0xbe   : > { %1680 = vmatmul.mubr.msk.bf16.vlgmr.msra.gmra.mrb[0].mxu0 %vm386_vm3, %v1678_v63  ;;  %v1135_v17 = vpop.permute.xlu1 %1134 }
  0xbf   : > { %895 = vmatpush1.bf16.msra.mxu0 %v886_v0  ;;  %926 = vmatprep.mubr.bf16.mxu0 %v1904_v9  ;;  %v1139_v21 = vsel %vm1136_vm8, %v1133_v10, %v1135_v17 }
  0xc0   : > { %1743 = vmatmul.mubr.msk.bf16.vlgmr.msra.gmra.mrb[0].mxu1 %vm386_vm3, %v1678_v63  ;;  %1687 = vmatprep.subr.msk.bf16.mxu0 %vm390_vm2, %v1009_v1  ;;  %v1258_v16 = vpop.permute.xlu0 %1257  ;;  %v1150_v25 = vsel %vm390_vm2, %v1139_v21, 0 }
  0xc1   : > { %1747 = vmatpush3.bf16.msra.mxu1 %v892_v2  ;;  %1748 = vmatprep.mubr.msk.bf16.mxu1 %vm1905_vm0, %v1903_v8 }
  0xc2   : > { %1752 = vmatprep.subr.bf16.mxu1 %v1903_v8  ;;  %v1260_v19 = vpop.permute.xlu1 %1259 }
  0xc3   : > { %v1266_v28 = vsel %vm1265_vm9, %v1258_v16, %v1260_v19 }
  0xc4   : > { %v1262_v20 = vpop.permute.xlu0 %1261  ;;  %v1273_v33 = vsel %vm390_vm2, %v1266_v28, 0 }
  0xc5   : > { %v1267_v24 = vsel %vm1265_vm9, %v1260_v19, %v1262_v20 }
  0xc6   : > { %v1264_v27 = vpop.permute.xlu1 %1263 }
  0xc7   : > { %v1268_v31 = vsel %vm1265_vm9, %v1262_v20, %v1264_v27 }
  0xc8   : > { %v1387_v26 = vpop.permute.xlu0 %1386  ;;  %v1279_v35 = vsel %vm390_vm2, %v1268_v31, 0 }
  0xca   : > { %1684 = vmatmul.mubr.msk.bf16.vlgmr.msra.gmra.mrb[0].mxu0 %vm386_vm3, %v1682_v12  ;;  %v1389_v29 = vpop.permute.xlu1 %1388 }
  0xcb   : > { %1024 = vmatpush1.bf16.msra.mxu0 %v1015_v13  ;;  %1055 = vmatprep.mubr.bf16.mxu0 %v1904_v9  ;;  %v1395_v37 = vsel %vm1394_vm10, %v1387_v26, %v1389_v29 }
  0xcc   : > { %1749 = vmatmul.mubr.msk.bf16.vlgmr.msra.gmra.mrb[0].mxu1 %vm386_vm3, %v1682_v12  ;;  %1691 = vmatprep.subr.msk.bf16.mxu0 %vm390_vm2, %v1138_v14  ;;  %v1391_v30 = vpop.permute.xlu0 %1390  ;;  %v1402_v40 = vsel %vm390_vm2, %v1395_v37, 0 }
  0xcd   : > { %1753 = vmatpush3.bf16.msra.mxu1 %v1021_v15  ;;  %1754 = vmatprep.mubr.msk.bf16.mxu1 %vm1905_vm0, %v1903_v8  ;;  %v1396_v34 = vsel %vm1394_vm10, %v1389_v29, %v1391_v30 }
  0xce   : > { %1758 = vmatprep.subr.bf16.mxu1 %v1903_v8  ;;  %v1393_v36 = vpop.permute.xlu1 %1392 }
  0xcf   : > { %v1397_v38 = vsel %vm1394_vm10, %v1391_v30, %v1393_v36 }
  0xd0   : > { %v1408_v41 = vsel %vm390_vm2, %v1397_v38, 0 }
  0xd6   : > { %1688 = vmatmul.mubr.msk.bf16.vlgmr.msra.gmra.mrb[0].mxu0 %vm386_vm3, %v1686_v22 }
  0xd7   : > { %1153 = vmatpush1.bf16.msra.mxu0 %v1144_v23  ;;  %1184 = vmatprep.mubr.bf16.mxu0 %v1904_v9 }
  0xd8   : > { %1755 = vmatmul.mubr.msk.bf16.vlgmr.msra.gmra.mrb[0].mxu1 %vm386_vm3, %v1686_v22  ;;  %1695 = vmatprep.subr.msk.bf16.mxu0 %vm390_vm2, %v1267_v24 }
  0xd9   : > { %1759 = vmatpush3.bf16.msra.mxu1 %v1150_v25  ;;  %1760 = vmatprep.mubr.msk.bf16.mxu1 %vm1905_vm0, %v1903_v8 }
  0xda   : > { %1764 = vmatprep.subr.bf16.mxu1 %v1903_v8 }
  0xe2   : > { %1692 = vmatmul.mubr.msk.bf16.vlgmr.msra.gmra.mrb[0].mxu0 %vm386_vm3, %v1690_v32 }
  0xe3   : > { %1282 = vmatpush1.bf16.msra.mxu0 %v1273_v33  ;;  %1313 = vmatprep.mubr.bf16.mxu0 %v1904_v9 }
  0xe4   : > { %1761 = vmatmul.mubr.msk.bf16.vlgmr.msra.gmra.mrb[0].mxu1 %vm386_vm3, %v1690_v32  ;;  %1699 = vmatprep.subr.msk.bf16.mxu0 %vm390_vm2, %v1396_v34 }
  0xe5   : > { %1765 = vmatpush3.bf16.msra.mxu1 %v1279_v35  ;;  %1766 = vmatprep.mubr.msk.bf16.mxu1 %vm1905_vm0, %v1903_v8 }
  0xe6   : > { %1770 = vmatprep.subr.bf16.mxu1 %v1903_v8 }
  0xee   : > { %1696 = vmatmul.mubr.msk.bf16.vlgmr.msra.gmra.mrb[0].mxu0 %vm386_vm3, %v1694_v39 }
  0xef   : > { %1411 = vmatpush1.bf16.msra.mxu0 %v1402_v40  ;;  %1442 = vmatprep.mubr.bf16.mxu0 %v1904_v9  ;;  %v1494_v9 = vld [vmem:[%s328_s26] sm:$0x7] }
  0xf0   : > { %1767 = vmatmul.mubr.msk.bf16.vlgmr.msra.gmra.mrb[0].mxu1 %vm386_vm3, %v1694_v39  ;;  %v1495_v43 = vunpack.c.l.bf16 %v1494_v9 }
  0xf1   : > { %1771 = vmatpush3.bf16.msra.mxu1 %v1408_v41  ;;  %1772 = vmatprep.mubr.msk.bf16.mxu1 %vm1905_vm0, %v1903_v8 }
  0xf2   : > { %v1500_v47 = vrot.slane %v1495_v43, %v1499_v44  ;;  %v1504_v48 = vrot.slane %v1495_v43, %v1503_v45  ;;  %v1508_v49 = vrot.slane %v1495_v43, %v1507_v46 }
  0xf4   : > { %v1515_v50 = vrot.slane %v1500_v47, %v1499_v44  ;;  %v1519_v51 = vrot.slane %v1504_v48, %v1499_v44  ;;  %v1523_v52 = vrot.slane %v1508_v49, %v1499_v44 }
  0xfa   : > { %1700 = vmatmul.mubr.msk.bf16.vlgmr.msra.gmra.mrb[0].mxu0 %vm386_vm3, %v1698_v42 }
  0xfc   : > { %1773 = vmatmul.mubr.msk.bf16.vlgmr.msra.gmra.mrb[0].mxu1 %vm386_vm3, %v1698_v42 }
 0x1cd   : > { %v1444_v53 = vpop.f32.mrb[0].mxu0 }
 0x1ce   : > { %v1524_v54 = vmul.f32 %v1515_v50, %v1444_v53  ;;  %v1446_v55 = vpop.f32.mrb[1].mxu0 }
 0x1cf   : > { %v1525_v56 = vmul.f32 %v1519_v51, %v1446_v55  ;;  %v1448_v57 = vpop.f32.mrb[2].mxu0  ;;  %v1485_v58 = vpop.f32.mrb[0].mxu1 }
 0x1d0   : > { %v1536_v59 = vmul.f32 %v1524_v54, %v1444_v53  ;;  %v1526_v60 = vmul.f32 %v1523_v52, %v1485_v58  ;;  %v1449_v61 = vpop.f32.mrb[3].mxu0  ;;  %v1774_v62 = vpop.f32.mrb[1].mxu1 }
 0x1d1   : > { %v1537_v63 = vmul.f32 %v1525_v56, %v1446_v55  ;;  %v1488_v6 = vpop.f32.mrb[2].mxu1  ;;  %v1528_v0 = vadd.f32 %v1525_v56, %v1524_v54 }
 0x1d2   : > { %v1538_v1 = vmul.f32 %v1526_v60, %v1485_v58  ;;  %v1775_v2 = vpop.f32.mrb[3].mxu1 }
 0x1d3   : > { %v1529_v3 = vadd.f32 %v1528_v0, %v1526_v60  ;;  %v1539_v4 = vadd.f32 %v1537_v63, %v1536_v59 }
 0x1d5   : > { %1530 = vadd.xlane.f32.xlu0 %v1529_v3  ;;  %v1540_v5 = vadd.f32 %v1539_v4, %v1538_v1 }
 0x1d7   : > { %1541 = vadd.xlane.f32.xlu1 %v1540_v5 }
 0x262   : > { %v1531_v10 = vpop.xlane.xlu0 %1530 }
 0x263   : > { %v1532_v12 = vadd.f32 %v1531_v10, %v1527_v7 }
 0x264   : > { %v1542_v13 = vpop.xlane.xlu1 %1541 }
 0x265   : > { %1534 = vst.msk [vmem:[%s2124_s23] sm:$0xff] %vm344_vm11, %v1532_v12  ;;  %v1543_v14 = vadd.f32 %v1542_v13, %v1535_v11 }
 0x267   : > { %1544 = vst.msk [vmem:[%s338_s28] sm:$0xff] %vm344_vm11, %v1543_v14 }
 0x268 PF: > { %s16_s20 = sadd.s32 1, %s1900_s20   ;;  %s2163_s18 = smov %s1896_s19 }
 0x269   : > { %p13_p8 = scmp.ge.s32.totalorder %s16_s20, 4   ;;  %s2164_s19 = smov %s2166_s21 }
 0x26b   :  { %15 = sbr.rel (!%p13_p8) target bundleno = 2 (0x2), region = 96 }

</bundles_post_ra>
